<compile_context>
chip_gen: v6e
topology: v6e:2x2x1
jax: 0.10.0
libtpu: 0.0.40
codegen_flags: <defaults>
</compile_context>

<pallas_src>
import functools
import math

import jax
import jax.numpy as jnp
from jax.experimental import pallas as pl
from jax.experimental.pallas import tpu as pltpu

_INV_SQRT2 = 0.7071067811865476
_NEG_INF = -1e30
_VMEM_LIMIT = 64 * 1024 * 1024     # fits every generation (v7x VMEM = 64 MiB)

# Set in __main__ (before any jit tracing) if this JAX build supports
# single-buffered constant blocks via pl.Buffered(1).
_BUF1_OK = False

_PAR1 = pltpu.CompilerParams(dimension_semantics=("parallel",),
                             vmem_limit_bytes=_VMEM_LIMIT)
_SEQ1 = pltpu.CompilerParams(vmem_limit_bytes=_VMEM_LIMIT)


# ----------------------------------------------------------------------------
# spec helpers
# ----------------------------------------------------------------------------
def _const_spec(shape):
    """BlockSpec for a grid-invariant (weight/bias) operand.

    Constant-index blocks are fetched once, so single-buffering them
    (pl.Buffered(1)) costs nothing and halves their VMEM footprint — this is
    what matters at full ViT-L scale on v7x (64 MiB VMEM) / v5e (16 MiB
    scoped default).  Falls back to default buffering if unsupported.
    """
    imap = lambda *_: (0,) * len(shape)
    if _BUF1_OK:
        return pl.BlockSpec(shape, imap, pipeline_mode=pl.Buffered(1))
    return pl.BlockSpec(shape, imap)


def _probe_buffered_one():
    """Return True iff pl.Buffered(1) single-buffering compiles and runs."""
    try:
        def k(x_ref, o_ref):
            o_ref[...] = x_ref[...] * 2.0
        spec = pl.BlockSpec((8, 128), lambda i: (0, 0),
                            pipeline_mode=pl.Buffered(1))
        out = pl.pallas_call(
            k, grid=(1,),
            in_specs=[spec],
            out_specs=pl.BlockSpec((8, 128), lambda i: (0, 0)),
            out_shape=jax.ShapeDtypeStruct((8, 128), jnp.float32),
        )(jnp.ones((8, 128), jnp.float32))
        jax.block_until_ready(out)
        return True
    except Exception:
        return False


# ----------------------------------------------------------------------------
# in-kernel helpers (plain jnp, traced inside the Pallas bodies)
# ----------------------------------------------------------------------------
def _layernorm(x, gamma, beta, eps):
    mean = jnp.mean(x, axis=-1, keepdims=True)
    xc = x - mean
    var = jnp.mean(xc * xc, axis=-1, keepdims=True)
    return xc * jax.lax.rsqrt(var + eps) * gamma + beta


_ERF_P = 0.3275911
_ERF_A = (0.254829592, -0.284496736, 1.421413741, -1.453152027, 1.061405429)


def _erf_approx(x):
    # Abramowitz & Stegun 7.1.26, |err| < 1.5e-7.  Uses only exp / div /
    # select, all of which have Mosaic lowering rules.
    ax = jnp.abs(x)
    t = 1.0 / (1.0 + _ERF_P * ax)
    a1, a2, a3, a4, a5 = _ERF_A
    poly = t * (a1 + t * (a2 + t * (a3 + t * (a4 + t * a5))))
    y = 1.0 - poly * jnp.exp(-ax * ax)
    return jnp.where(x >= 0.0, y, -y)


def _gelu(x):
    # PyTorch F.gelu default = exact erf formulation.
    return 0.5 * x * (1.0 + _erf_approx(x * _INV_SQRT2))


# ----------------------------------------------------------------------------
# Pallas kernels
# ----------------------------------------------------------------------------
def _embed_preln_kernel(patch_ref, wpe_ref, cls_ref, pos_ref, g_ref, b_ref,
                        o_ref, *, eps):
    """Per-batch: patch-embed matmul + cls concat + pos add + pre-LayerNorm.

    The full (s_pad, D) tile is assembled in registers and written with one
    unmasked, lane/sublane-dense store.  Pad rows are zero before LN (they
    become beta=0 after LN) and are key-masked inside attention.
    """
    p = patch_ref.shape[1]
    d = wpe_ref.shape[1]
    s_real = p + 1
    s_pad = o_ref.shape[1]

    emb = jnp.dot(patch_ref[0].astype(jnp.bfloat16), wpe_ref[...],
                  preferred_element_type=jnp.float32)             # (P, D)
    rows = jnp.concatenate([cls_ref[...].astype(jnp.float32), emb], axis=0)
    rows = rows + pos_ref[...].astype(jnp.float32)                # (s_real, D)
    if s_pad > s_real:
        rows = jnp.concatenate(
            [rows, jnp.zeros((s_pad - s_real, d), jnp.float32)], axis=0)
    out = _layernorm(rows, g_ref[...], b_ref[...], eps)
    o_ref[0] = out.astype(o_ref.dtype)                            # single store


def _attn_block_kernel(x_ref, g_ref, b_ref, wqkv_ref, bqkv_ref, wout_ref,
                       bout_ref, o_ref, *, nhead, s_real, eps):
    """Fused pre-norm attention block for one batch element.

    y = x + out_proj(MHA(LN1(x))); qkv, scores and contexts never leave VMEM.
    Heads are handled with static lane slices of the (S, 3D) qkv buffer, the
    per-head contexts are lane-concatenated and folded through ONE full-K
    out-projection matmul (full MXU utilisation instead of K=Dh underfill).
    """
    x = x_ref[0].astype(jnp.float32)                     # (S_pad, D)
    s_pad, d = x.shape
    dh = d // nhead
    scale = 1.0 / math.sqrt(dh)

    xn = _layernorm(x, g_ref[...], b_ref[...], eps)
    qkv = jnp.dot(xn.astype(jnp.bfloat16), wqkv_ref[...],
                  preferred_element_type=jnp.float32) + bqkv_ref[...]  # (S,3D)

    # additive key-padding bias (0 / -1e30), computed once for all heads
    if s_real < s_pad:
        kbias = jnp.where(
            jax.lax.broadcasted_iota(jnp.int32, (1, s_pad), 1) < s_real,
            0.0, _NEG_INF).astype(jnp.float32)
    else:
        kbias = None

    # NOTE: at full scale (nhead=16) convert this trace-unrolled loop into
    # lax.fori_loop(..., unroll=2) over pl.ds lane slices to bound vregs.
    ctx_heads = []
    for h in range(nhead):
        lo = h * dh
        qh = (qkv[:, lo:lo + dh] * scale).astype(jnp.bfloat16)
        kh = qkv[:, d + lo:d + lo + dh].astype(jnp.bfloat16)
        vh = qkv[:, 2 * d + lo:2 * d + lo + dh].astype(jnp.bfloat16)
        s = jax.lax.dot_general(qh, kh, (((1,), (1,)), ((), ())),
                                preferred_element_type=jnp.float32)   # (S, S)
        if kbias is not None:
            s = s + kbias
        m = jnp.max(s, axis=-1, keepdims=True)
        p = jnp.exp(s - m)
        l = jnp.sum(p, axis=-1, keepdims=True)
        ctx = jnp.dot(p.astype(jnp.bfloat16), vh,
                      preferred_element_type=jnp.float32)             # (S, Dh)
        ctx_heads.append(ctx * pl.reciprocal(l, approx=True))

    ctx_all = jnp.concatenate(ctx_heads, axis=-1).astype(jnp.bfloat16)  # (S, D)
    attn = jnp.dot(ctx_all, wout_ref[...],
                   preferred_element_type=jnp.float32)                 # (S, D)
    o_ref[0] = (x + attn + bout_ref[...]).astype(o_ref.dtype)


def _ff_block_kernel(x_ref, g_ref, b_ref, w1_ref, b1_ref, w2_ref, b2_ref,
                     o_ref, *, eps):
    """Fused pre-norm MLP block on a row tile: y = x + FF2(GELU(FF1(LN2(x))))."""
    x = x_ref[...].astype(jnp.float32)                   # (TM, D)
    xn = _layernorm(x, g_ref[...], b_ref[...], eps)
    h = jnp.dot(xn.astype(jnp.bfloat16), w1_ref[...],
                preferred_element_type=jnp.float32) + b1_ref[...]
    h = _gelu(h)
    y = jnp.dot(h.astype(jnp.bfloat16), w2_ref[...],
                preferred_element_type=jnp.float32) + b2_ref[...]
    o_ref[...] = (x + y).astype(o_ref.dtype)


def _head_kernel(x_ref, g_ref, b_ref, w1_ref, b1_ref, w2_ref, b2_ref, o_ref,
                 *, eps):
    """Fused mlp_head on the cls row: LayerNorm -> Linear(D,D) -> Linear(D,out)."""
    x = x_ref[:, 0, :].astype(jnp.float32)               # (N, D) cls tokens
    xn = _layernorm(x, g_ref[...], b_ref[...], eps)
    y = jnp.dot(xn.astype(jnp.bfloat16), w1_ref[...],
                preferred_element_type=jnp.float32) + b1_ref[...]
    y = jnp.dot(y.astype(jnp.bfloat16), w2_ref[...],
                preferred_element_type=jnp.float32) + b2_ref[...]
    o_ref[...] = y.astype(o_ref.dtype)


# ----------------------------------------------------------------------------
# Pallas wrappers
# ----------------------------------------------------------------------------
def pallas_embed_preln(patches, w_pe, cls_tok, pos_emb, gamma, beta, s_pad,
                       eps=1e-5):
    n, p, pd = patches.shape
    d = w_pe.shape[1]
    s_real = p + 1
    return pl.pallas_call(
        functools.partial(_embed_preln_kernel, eps=eps),
        grid=(n,),
        in_specs=[
            pl.BlockSpec((1, p, pd), lambda i: (i, 0, 0)),
            _const_spec((pd, d)),
            _const_spec((1, d)),
            _const_spec((s_real, d)),
            _const_spec((1, d)),
            _const_spec((1, d)),
        ],
        out_specs=pl.BlockSpec((1, s_pad, d), lambda i: (i, 0, 0)),
        out_shape=jax.ShapeDtypeStruct((n, s_pad, d), jnp.bfloat16),
        compiler_params=_PAR1,
    )(patches, w_pe, cls_tok.reshape(1, d), pos_emb.reshape(s_real, d),
      gamma.reshape(1, d), beta.reshape(1, d))


def pallas_attn_block(x, lp, nhead, s_real, eps=1e-5):
    n, s_pad, d = x.shape
    return pl.pallas_call(
        functools.partial(_attn_block_kernel, nhead=nhead, s_real=s_real,
                          eps=eps),
        grid=(n,),
        in_specs=[
            pl.BlockSpec((1, s_pad, d), lambda i: (i, 0, 0)),
            _const_spec((1, d)),
            _const_spec((1, d)),
            _const_spec((d, 3 * d)),
            _const_spec((1, 3 * d)),
            _const_spec((d, d)),
            _const_spec((1, d)),
        ],
        out_specs=pl.BlockSpec((1, s_pad, d), lambda i: (i, 0, 0)),
        out_shape=jax.ShapeDtypeStruct((n, s_pad, d), jnp.bfloat16),
        compiler_params=_PAR1,
    )(x, lp["ln1_g"].reshape(1, d), lp["ln1_b"].reshape(1, d),
      lp["in_proj_w"], lp["in_proj_b"].reshape(1, 3 * d),
      lp["out_proj_w"], lp["out_proj_b"].reshape(1, d))


def pallas_ff_block(x, lp, eps=1e-5):
    n, s_pad, d = x.shape
    m = n * s_pad
    f = lp["ff1_w"].shape[1]
    # Large fixed row tile + cdiv grid (Pallas masks any ragged tail) instead
    # of a divisor search that can degrade to MXU-starving tiny tiles.
    tm = 512 if m >= 512 else m          # m is always a multiple of 8
    x2 = x.reshape(m, d)
    y = pl.pallas_call(
        functools.partial(_ff_block_kernel, eps=eps),
        grid=(pl.cdiv(m, tm),),
        in_specs=[
            pl.BlockSpec((tm, d), lambda i: (i, 0)),
            _const_spec((1, d)),
            _const_spec((1, d)),
            _const_spec((d, f)),
            _const_spec((1, f)),
            _const_spec((f, d)),
            _const_spec((1, d)),
        ],
        out_specs=pl.BlockSpec((tm, d), lambda i: (i, 0)),
        out_shape=jax.ShapeDtypeStruct((m, d), jnp.bfloat16),
        compiler_params=_PAR1,
    )(x2, lp["ln2_g"].reshape(1, d), lp["ln2_b"].reshape(1, d),
      lp["ff1_w"], lp["ff1_b"].reshape(1, f),
      lp["ff2_w"], lp["ff2_b"].reshape(1, d))
    return y.reshape(n, s_pad, d)


def pallas_head(h, g, b, w1, b1, w2, b2, eps=1e-5):
    n, s_pad, d = h.shape
    dout = w2.shape[1]
    # Pull the cls row straight out of h via the BlockSpec (first 8 sequence
    # rows DMA'd, row 0 used) — no JAX-side h[:, 0, :] HBM slice pass.
    return pl.pallas_call(
        functools.partial(_head_kernel, eps=eps),
        grid=(1,),
        in_specs=[
            pl.BlockSpec((n, 8, d), lambda i: (0, 0, 0)),
            _const_spec((1, d)),
            _const_spec((1, d)),
            _const_spec((d, d)),
            _const_spec((1, d)),
            _const_spec((d, dout)),
            _const_spec((1, dout)),
        ],
        out_specs=pl.BlockSpec((n, dout), lambda i: (0, 0)),
        out_shape=jax.ShapeDtypeStruct((n, dout), jnp.float32),
        compiler_params=_SEQ1,
    )(h, g.reshape(1, d), b.reshape(1, d),
      w1, b1.reshape(1, d), w2, b2.reshape(1, dout))


# ----------------------------------------------------------------------------
# Model (pre-norm ViT, matching the PyTorch module's forward)
# ----------------------------------------------------------------------------
class Cfg:
    def __init__(self):
        # scaled-down ViTLat224: full size is (3,224,224,p=14,D=1024,24L,16H,4096)
        self.c, self.h, self.w = 3, 16, 16
        self.p = 8
        self.n_layers = 2
        self.D = 128
        self.mlp = 256
        self.nhead = 4
        self.dim_out = 16
        self.n_patches = (self.h // self.p) * (self.w // self.p)
        self.seq = self.n_patches + 1
        self.seq_pad = ((self.seq + 7) // 8) * 8


def init_params(key, cfg):
    D, mlp, dim_out = cfg.D, cfg.mlp, cfg.dim_out
    patch_dim = cfg.p * cfg.p * cfg.c
    seq = cfg.seq
    keys = iter(jax.random.split(key, 16 + 8 * cfg.n_layers))

    def rnd(shape, scale=0.02):
        # large weight matrices live in bf16 in HBM (halved DMA, bf16 MXU)
        return (scale * jax.random.normal(next(keys), shape, jnp.float32)
                ).astype(jnp.bfloat16)

    params = {
        # nn.Parameter(torch.randn(...)) analogues
        "patch_embedding": jax.random.normal(
            next(keys), (patch_dim, D), jnp.float32).astype(jnp.bfloat16),
        "class_token": jax.random.normal(next(keys), (1, 1, D), jnp.float32),
        "pos_embedding": jax.random.normal(next(keys), (1, seq, D), jnp.float32),
        # pre-transformer LayerNorm
        "ln_pre_g": jnp.ones((D,), jnp.float32),
        "ln_pre_b": jnp.zeros((D,), jnp.float32),
        # mlp_head: LayerNorm -> Linear(D,D) -> Linear(D,dim_out)
        "head_ln_g": jnp.ones((D,), jnp.float32),
        "head_ln_b": jnp.zeros((D,), jnp.float32),
        "head_w1": rnd((D, D)),
        "head_b1": jnp.zeros((D,), jnp.float32),
        "head_w2": rnd((D, dim_out)),
        "head_b2": jnp.zeros((dim_out,), jnp.float32),
        "layers": [],
    }
    for _ in range(cfg.n_layers):
        params["layers"].append({
            "ln1_g": jnp.ones((D,), jnp.float32),
            "ln1_b": jnp.zeros((D,), jnp.float32),
            # NOTE: (in, out) layout with q|k|v column blocks; transpose of
            # PyTorch's in_proj_weight layout (real checkpoints must be
            # transposed/re-packed before loading).
            "in_proj_w": rnd((D, 3 * D)),
            "in_proj_b": jnp.zeros((3 * D,), jnp.float32),
            "out_proj_w": rnd((D, D)),
            "out_proj_b": jnp.zeros((D,), jnp.float32),
            "ln2_g": jnp.ones((D,), jnp.float32),
            "ln2_b": jnp.zeros((D,), jnp.float32),
            "ff1_w": rnd((D, mlp)),
            "ff1_b": jnp.zeros((mlp,), jnp.float32),
            "ff2_w": rnd((mlp, D)),
            "ff2_b": jnp.zeros((D,), jnp.float32),
        })
    return params


def vit_forward(params, x, cfg):
    N, c, Hh, Ww = x.shape
    p = cfg.p
    nh, nw = Hh // p, Ww // p
    s_real = nh * nw + 1

    # rearrange 'b c (h p1) (w p2) -> b (h w) (p1 p2 c)'  (pure layout glue)
    xp = x.reshape(N, c, nh, p, nw, p)
    xp = jnp.transpose(xp, (0, 2, 4, 3, 5, 1))
    xp = xp.reshape(N, nh * nw, p * p * c).astype(jnp.bfloat16)

    # fused: patch-embed matmul + cls concat + pos add + pre-LN (+ seq padding)
    h = pallas_embed_preln(xp, params["patch_embedding"], params["class_token"],
                           params["pos_embedding"], params["ln_pre_g"],
                           params["ln_pre_b"], cfg.seq_pad)

    for lp in params["layers"]:
        h = pallas_attn_block(h, lp, cfg.nhead, s_real)   # LN1+QKV+MHA+proj+res
        h = pallas_ff_block(h, lp)                        # LN2+FF1+GELU+FF2+res

    # to_latent = Identity; head reads the cls row (row 0) via its BlockSpec.
    return pallas_head(h, params["head_ln_g"], params["head_ln_b"],
                       params["head_w1"], params["head_b1"],
                       params["head_w2"], params["head_b2"])


# ----------------------------------------------------------------------------
# pure-JAX reference (mirrors the PyTorch module) for correctness checking
# ----------------------------------------------------------------------------
def _ln_ref(x, g, b, eps=1e-5):
    m = jnp.mean(x, -1, keepdims=True)
    v = jnp.mean((x - m) ** 2, -1, keepdims=True)
    return (x - m) * jax.lax.rsqrt(v + eps) * g + b


def _f32(a):
    return a.astype(jnp.float32)


def vit_reference(params, x, cfg):
    N, c, Hh, Ww = x.shape
    p = cfg.p
    nh, nw = Hh // p, Ww // p
    D = cfg.D
    H = cfg.nhead
    Dh = D // H
    xp = x.reshape(N, c, nh, p, nw, p)
    xp = jnp.transpose(xp, (0, 2, 4, 3, 5, 1)).reshape(N, nh * nw, p * p * c)
    tok = xp @ _f32(params["patch_embedding"])
    cls = jnp.broadcast_to(params["class_token"], (N, 1, D))
    h = jnp.concatenate([cls, tok], axis=1) + params["pos_embedding"]
    h = _ln_ref(h, params["ln_pre_g"], params["ln_pre_b"])
    for lp in params["layers"]:
        xn = _ln_ref(h, lp["ln1_g"], lp["ln1_b"])
        qkv = xn @ _f32(lp["in_proj_w"]) + lp["in_proj_b"]
        q, k, v = qkv[..., :D], qkv[..., D:2 * D], qkv[..., 2 * D:]
        q = q.reshape(N, -1, H, Dh).transpose(0, 2, 1, 3)
        k = k.reshape(N, -1, H, Dh).transpose(0, 2, 1, 3)
        v = v.reshape(N, -1, H, Dh).transpose(0, 2, 1, 3)
        s = jnp.einsum("bhqd,bhkd->bhqk", q, k) / math.sqrt(Dh)
        pmat = jax.nn.softmax(s, axis=-1)
        ctx = jnp.einsum("bhqk,bhkd->bhqd", pmat, v)
        ctx = ctx.transpose(0, 2, 1, 3).reshape(N, -1, D)
        h = h + (ctx @ _f32(lp["out_proj_w"]) + lp["out_proj_b"])
        xn = _ln_ref(h, lp["ln2_g"], lp["ln2_b"])
        z = xn @ _f32(lp["ff1_w"]) + lp["ff1_b"]
        ff = 0.5 * z * (1.0 + jax.lax.erf(z * _INV_SQRT2))
        h = h + (ff @ _f32(lp["ff2_w"]) + lp["ff2_b"])
    y = _ln_ref(h[:, 0], params["head_ln_g"], params["head_ln_b"])
    y = y @ _f32(params["head_w1"]) + params["head_b1"]
    y = y @ _f32(params["head_w2"]) + params["head_b2"]
    return y


if __name__ == "__main__":
    cfg = Cfg()
    key = jax.random.PRNGKey(0)
    kx, kp = jax.random.split(key)
    x = jax.random.normal(kx, (2, cfg.c, cfg.h, cfg.w), jnp.float32)
    params = init_params(kp, cfg)

    # Feature-detect single-buffered constant blocks before jit tracing.
    _BUF1_OK = _probe_buffered_one()

    fwd = jax.jit(functools.partial(vit_forward, cfg=cfg))
    out = fwd(params, x)
    jax.block_until_ready(out)

    assert out.shape == (2, cfg.dim_out), out.shape
    assert bool(jnp.all(jnp.isfinite(out)))

    ref = vit_reference(params, x, cfg)
    err = float(jnp.max(jnp.abs(out - ref)))
    # Tolerance covers bf16 storage of weights/activations (reference is f32).
    assert err < 2e-2, f"max abs error vs reference: {err}"

    print("KERNEL_OK")
</pallas_src>

<mosaic_0001>
module attributes {stable_mosaic.version = 11 : i64} {
  func.func @k(%arg0: i32, %arg1: memref<8x128xf32, #tpu.memory_space<vmem>>, %arg2: memref<8x128xf32, #tpu.memory_space<vmem>>) attributes {dimension_semantics = [#tpu.dimension_semantics<arbitrary>], iteration_bounds = array<i64: 1>, scalar_prefetch = 0 : i64, scratch_operands = 0 : i64, tpu.core_type = #tpu.core_type<tc>, window_params = [{pipeline_mode = #tpu.pipeline_mode<synchronous>, transform_indices = @transform_0, window_bounds = array<i64: 8, 128>}, {pipeline_mode = #tpu.pipeline_mode<synchronous>, transform_indices = @transform_1, window_bounds = array<i64: 8, 128>}]} {
    %c0 = arith.constant 0 : index
    %c0_0 = arith.constant 0 : index
    %0 = vector.load %arg1[%c0, %c0_0] : memref<8x128xf32, #tpu.memory_space<vmem>>, vector<8x128xf32>
    %cst = arith.constant 2.000000e+00 : f32
    %1 = vector.broadcast %cst : f32 to vector<8x128xf32>
    %2 = arith.mulf %0, %1 : vector<8x128xf32>
    %c0_1 = arith.constant 0 : index
    %c0_2 = arith.constant 0 : index
    %3 = vector.load %arg2[%c0_1, %c0_2] : memref<8x128xf32, #tpu.memory_space<vmem>>, vector<8x128xf32>
    tpu.vector_store %arg2[%c0_1, %c0_2], %2 {strides = array<i32>} : memref<8x128xf32, #tpu.memory_space<vmem>>, vector<8x128xf32>,
    return
  }
  func.func @transform_0(%arg0: i32) -> (i32, i32) {
    %c0_i32 = arith.constant 0 : i32
    %c0_i32_0 = arith.constant 0 : i32
    %c0_i32_1 = arith.constant 0 : i32
    return %c0_i32, %c0_i32_0 : i32, i32
  }
  func.func @transform_1(%arg0: i32) -> (i32, i32) {
    %c0_i32 = arith.constant 0 : i32
    %c0_i32_0 = arith.constant 0 : i32
    %c0_i32_1 = arith.constant 0 : i32
    return %c0_i32, %c0_i32_0 : i32, i32
  }
}

module attributes {stable_mosaic.version = 11 : i64} {
  func.func @_embed_preln_kernel(%arg0: i32, %arg1: memref<1x4x192xbf16, #tpu.memory_space<vmem>>, %arg2: memref<192x128xbf16, #tpu.memory_space<vmem>>, %arg3: memref<1x128xf32, #tpu.memory_space<vmem>>, %arg4: memref<5x128xf32, #tpu.memory_space<vmem>>, %arg5: memref<1x128xf32, #tpu.memory_space<vmem>>, %arg6: memref<1x128xf32, #tpu.memory_space<vmem>>, %arg7: memref<1x8x128xbf16, #tpu.memory_space<vmem>>) attributes {dimension_semantics = [#tpu.dimension_semantics<parallel>], iteration_bounds = array<i64: 2>, scalar_prefetch = 0 : i64, scratch_operands = 0 : i64, tpu.core_type = #tpu.core_type<tc>, window_params = [{transform_indices = @transform_0, window_bounds = array<i64: 1, 4, 192>}, {pipeline_mode = #tpu.pipeline_mode<synchronous>, transform_indices = @transform_1, window_bounds = array<i64: 192, 128>}, {pipeline_mode = #tpu.pipeline_mode<synchronous>, transform_indices = @transform_2, window_bounds = array<i64: 1, 128>}, {pipeline_mode = #tpu.pipeline_mode<synchronous>, transform_indices = @transform_3, window_bounds = array<i64: 5, 128>}, {pipeline_mode = #tpu.pipeline_mode<synchronous>, transform_indices = @transform_4, window_bounds = array<i64: 1, 128>}, {pipeline_mode = #tpu.pipeline_mode<synchronous>, transform_indices = @transform_5, window_bounds = array<i64: 1, 128>}, {transform_indices = @transform_6, window_bounds = array<i64: 1, 8, 128>}]} {
    %c0 = arith.constant 0 : index
    %c0_0 = arith.constant 0 : index
    %c0_1 = arith.constant 0 : index
    %0 = vector.load %arg1[%c0, %c0_0, %c0_1] : memref<1x4x192xbf16, #tpu.memory_space<vmem>>, vector<1x4x192xbf16>
    %1 = vector.shape_cast %0 : vector<1x4x192xbf16> to vector<4x192xbf16>
    %c0_2 = arith.constant 0 : index
    %c0_3 = arith.constant 0 : index
    %2 = vector.load %arg2[%c0_2, %c0_3] : memref<192x128xbf16, #tpu.memory_space<vmem>>, vector<192x128xbf16>
    %cst = arith.constant dense<0.000000e+00> : vector<4x128xf32>
    %3 = tpu.matmul %1, %2, %cst {dimension_numbers = #tpu.dot_dimension_numbers<[1], [0], [0], [1], [0, 0, 1, 1], [], []>} : vector<4x192xbf16>, vector<192x128xbf16>, vector<4x128xf32> -> vector<4x128xf32>
    %c0_4 = arith.constant 0 : index
    %c0_5 = arith.constant 0 : index
    %4 = vector.load %arg3[%c0_4, %c0_5] : memref<1x128xf32, #tpu.memory_space<vmem>>, vector<1x128xf32>
    %5 = tpu.concatenate %4, %3 in 0 : vector<1x128xf32>, vector<4x128xf32> -> vector<5x128xf32>
    %c0_6 = arith.constant 0 : index
    %c0_7 = arith.constant 0 : index
    %6 = vector.load %arg4[%c0_6, %c0_7] : memref<5x128xf32, #tpu.memory_space<vmem>>, vector<5x128xf32>
    %7 = arith.addf %5, %6 : vector<5x128xf32>
    %cst_8 = arith.constant 0.000000e+00 : f32
    %8 = vector.broadcast %cst_8 : f32 to vector<3x128xf32>
    %9 = tpu.concatenate %7, %8 in 0 : vector<5x128xf32>, vector<3x128xf32> -> vector<8x128xf32>
    %c0_9 = arith.constant 0 : index
    %c0_10 = arith.constant 0 : index
    %10 = vector.load %arg5[%c0_9, %c0_10] : memref<1x128xf32, #tpu.memory_space<vmem>>, vector<1x128xf32>
    %c0_11 = arith.constant 0 : index
    %c0_12 = arith.constant 0 : index
    %11 = vector.load %arg6[%c0_11, %c0_12] : memref<1x128xf32, #tpu.memory_space<vmem>>, vector<1x128xf32>
    %cst_13 = arith.constant dense<0.000000e+00> : vector<8xf32>
    %12 = vector.multi_reduction <add>, %9, %cst_13 [1] : vector<8x128xf32> to vector<8xf32>
    %13 = vector.shape_cast %12 : vector<8xf32> to vector<8x1xf32>
    %cst_14 = arith.constant 1.280000e+02 : f32
    %14 = vector.broadcast %cst_14 : f32 to vector<8x1xf32>
    %15 = arith.divf %13, %14 : vector<8x1xf32>
    %16 = vector.broadcast %15 : vector<8x1xf32> to vector<8x128xf32>
    %17 = arith.subf %9, %16 : vector<8x128xf32>
    %18 = arith.mulf %17, %17 : vector<8x128xf32>
    %cst_15 = arith.constant dense<0.000000e+00> : vector<8xf32>
    %19 = vector.multi_reduction <add>, %18, %cst_15 [1] : vector<8x128xf32> to vector<8xf32>
    %20 = vector.shape_cast %19 : vector<8xf32> to vector<8x1xf32>
    %cst_16 = arith.constant 1.280000e+02 : f32
    %21 = vector.broadcast %cst_16 : f32 to vector<8x1xf32>
    %22 = arith.divf %20, %21 : vector<8x1xf32>
    %cst_17 = arith.constant 9.99999974E-6 : f32
    %23 = vector.broadcast %cst_17 : f32 to vector<8x1xf32>
    %24 = arith.addf %22, %23 : vector<8x1xf32>
    %25 = math.rsqrt %24 : vector<8x1xf32>
    %26 = vector.broadcast %25 : vector<8x1xf32> to vector<8x128xf32>
    %27 = arith.mulf %17, %26 : vector<8x128xf32>
    %28 = vector.broadcast %10 : vector<1x128xf32> to vector<8x128xf32>
    %29 = arith.mulf %27, %28 : vector<8x128xf32>
    %30 = vector.broadcast %11 : vector<1x128xf32> to vector<8x128xf32>
    %31 = arith.addf %29, %30 : vector<8x128xf32>
    %32 = arith.truncf %31 : vector<8x128xf32> to vector<8x128xbf16>
    %c0_18 = arith.constant 0 : index
    %c0_19 = arith.constant 0 : index
    %c0_20 = arith.constant 0 : index
    %33 = vector.load %arg7[%c0_18, %c0_19, %c0_20] : memref<1x8x128xbf16, #tpu.memory_space<vmem>>, vector<1x8x128xbf16>
    %34 = vector.shape_cast %33 : vector<1x8x128xbf16> to vector<8x128xbf16>
    %35 = vector.shape_cast %32 : vector<8x128xbf16> to vector<1x8x128xbf16>
    tpu.vector_store %arg7[%c0_18, %c0_19, %c0_20], %35 {strides = array<i32>} : memref<1x8x128xbf16, #tpu.memory_space<vmem>>, vector<1x8x128xbf16>,
    return
  }
  func.func @transform_0(%arg0: i32) -> (i32, i32, i32) {
    %c0_i32 = arith.constant 0 : i32
    %c0_i32_0 = arith.constant 0 : i32
    %c0_i32_1 = arith.constant 0 : i32
    return %arg0, %c0_i32, %c0_i32_0 : i32, i32, i32
  }
  func.func @transform_1(%arg0: i32) -> (i32, i32) {
    %c0_i32 = arith.constant 0 : i32
    %c0_i32_0 = arith.constant 0 : i32
    %c0_i32_1 = arith.constant 0 : i32
    return %c0_i32, %c0_i32_0 : i32, i32
  }
  func.func @transform_2(%arg0: i32) -> (i32, i32) {
    %c0_i32 = arith.constant 0 : i32
    %c0_i32_0 = arith.constant 0 : i32
    %c0_i32_1 = arith.constant 0 : i32
    return %c0_i32, %c0_i32_0 : i32, i32
  }
  func.func @transform_3(%arg0: i32) -> (i32, i32) {
    %c0_i32 = arith.constant 0 : i32
    %c0_i32_0 = arith.constant 0 : i32
    %c0_i32_1 = arith.constant 0 : i32
    return %c0_i32, %c0_i32_0 : i32, i32
  }
  func.func @transform_4(%arg0: i32) -> (i32, i32) {
    %c0_i32 = arith.constant 0 : i32
    %c0_i32_0 = arith.constant 0 : i32
    %c0_i32_1 = arith.constant 0 : i32
    return %c0_i32, %c0_i32_0 : i32, i32
  }
  func.func @transform_5(%arg0: i32) -> (i32, i32) {
    %c0_i32 = arith.constant 0 : i32
    %c0_i32_0 = arith.constant 0 : i32
    %c0_i32_1 = arith.constant 0 : i32
    return %c0_i32, %c0_i32_0 : i32, i32
  }
  func.func @transform_6(%arg0: i32) -> (i32, i32, i32) {
    %c0_i32 = arith.constant 0 : i32
    %c0_i32_0 = arith.constant 0 : i32
    %c0_i32_1 = arith.constant 0 : i32
    return %arg0, %c0_i32, %c0_i32_0 : i32, i32, i32
  }
}

module attributes {stable_mosaic.version = 11 : i64} {
  func.func @_attn_block_kernel(%arg0: i32, %arg1: memref<1x8x128xbf16, #tpu.memory_space<vmem>>, %arg2: memref<1x128xf32, #tpu.memory_space<vmem>>, %arg3: memref<1x128xf32, #tpu.memory_space<vmem>>, %arg4: memref<128x384xbf16, #tpu.memory_space<vmem>>, %arg5: memref<1x384xf32, #tpu.memory_space<vmem>>, %arg6: memref<128x128xbf16, #tpu.memory_space<vmem>>, %arg7: memref<1x128xf32, #tpu.memory_space<vmem>>, %arg8: memref<1x8x128xbf16, #tpu.memory_space<vmem>>) attributes {dimension_semantics = [#tpu.dimension_semantics<parallel>], iteration_bounds = array<i64: 2>, scalar_prefetch = 0 : i64, scratch_operands = 0 : i64, tpu.core_type = #tpu.core_type<tc>, window_params = [{transform_indices = @transform_0, window_bounds = array<i64: 1, 8, 128>}, {pipeline_mode = #tpu.pipeline_mode<synchronous>, transform_indices = @transform_1, window_bounds = array<i64: 1, 128>}, {pipeline_mode = #tpu.pipeline_mode<synchronous>, transform_indices = @transform_2, window_bounds = array<i64: 1, 128>}, {pipeline_mode = #tpu.pipeline_mode<synchronous>, transform_indices = @transform_3, window_bounds = array<i64: 128, 384>}, {pipeline_mode = #tpu.pipeline_mode<synchronous>, transform_indices = @transform_4, window_bounds = array<i64: 1, 384>}, {pipeline_mode = #tpu.pipeline_mode<synchronous>, transform_indices = @transform_5, window_bounds = array<i64: 128, 128>}, {pipeline_mode = #tpu.pipeline_mode<synchronous>, transform_indices = @transform_6, window_bounds = array<i64: 1, 128>}, {transform_indices = @transform_7, window_bounds = array<i64: 1, 8, 128>}]} {
    %c0 = arith.constant 0 : index
    %c0_0 = arith.constant 0 : index
    %c0_1 = arith.constant 0 : index
    %0 = vector.load %arg1[%c0, %c0_0, %c0_1] : memref<1x8x128xbf16, #tpu.memory_space<vmem>>, vector<1x8x128xbf16>
    %1 = vector.shape_cast %0 : vector<1x8x128xbf16> to vector<8x128xbf16>
    %2 = arith.extf %1 : vector<8x128xbf16> to vector<8x128xf32>
    %c0_2 = arith.constant 0 : index
    %c0_3 = arith.constant 0 : index
    %3 = vector.load %arg2[%c0_2, %c0_3] : memref<1x128xf32, #tpu.memory_space<vmem>>, vector<1x128xf32>
    %c0_4 = arith.constant 0 : index
    %c0_5 = arith.constant 0 : index
    %4 = vector.load %arg3[%c0_4, %c0_5] : memref<1x128xf32, #tpu.memory_space<vmem>>, vector<1x128xf32>
    %cst = arith.constant dense<0.000000e+00> : vector<8xf32>
    %5 = vector.multi_reduction <add>, %2, %cst [1] : vector<8x128xf32> to vector<8xf32>
    %6 = vector.shape_cast %5 : vector<8xf32> to vector<8x1xf32>
    %cst_6 = arith.constant 1.280000e+02 : f32
    %7 = vector.broadcast %cst_6 : f32 to vector<8x1xf32>
    %8 = arith.divf %6, %7 : vector<8x1xf32>
    %9 = vector.broadcast %8 : vector<8x1xf32> to vector<8x128xf32>
    %10 = arith.subf %2, %9 : vector<8x128xf32>
    %11 = arith.mulf %10, %10 : vector<8x128xf32>
    %cst_7 = arith.constant dense<0.000000e+00> : vector<8xf32>
    %12 = vector.multi_reduction <add>, %11, %cst_7 [1] : vector<8x128xf32> to vector<8xf32>
    %13 = vector.shape_cast %12 : vector<8xf32> to vector<8x1xf32>
    %cst_8 = arith.constant 1.280000e+02 : f32
    %14 = vector.broadcast %cst_8 : f32 to vector<8x1xf32>
    %15 = arith.divf %13, %14 : vector<8x1xf32>
    %cst_9 = arith.constant 9.99999974E-6 : f32
    %16 = vector.broadcast %cst_9 : f32 to vector<8x1xf32>
    %17 = arith.addf %15, %16 : vector<8x1xf32>
    %18 = math.rsqrt %17 : vector<8x1xf32>
    %19 = vector.broadcast %18 : vector<8x1xf32> to vector<8x128xf32>
    %20 = arith.mulf %10, %19 : vector<8x128xf32>
    %21 = vector.broadcast %3 : vector<1x128xf32> to vector<8x128xf32>
    %22 = arith.mulf %20, %21 : vector<8x128xf32>
    %23 = vector.broadcast %4 : vector<1x128xf32> to vector<8x128xf32>
    %24 = arith.addf %22, %23 : vector<8x128xf32>
    %25 = arith.truncf %24 : vector<8x128xf32> to vector<8x128xbf16>
    %c0_10 = arith.constant 0 : index
    %c0_11 = arith.constant 0 : index
    %26 = vector.load %arg4[%c0_10, %c0_11] : memref<128x384xbf16, #tpu.memory_space<vmem>>, vector<128x384xbf16>
    %cst_12 = arith.constant dense<0.000000e+00> : vector<8x384xf32>
    %27 = tpu.matmul %25, %26, %cst_12 {dimension_numbers = #tpu.dot_dimension_numbers<[1], [0], [0], [1], [0, 0, 1, 1], [], []>} : vector<8x128xbf16>, vector<128x384xbf16>, vector<8x384xf32> -> vector<8x384xf32>
    %c0_13 = arith.constant 0 : index
    %c0_14 = arith.constant 0 : index
    %28 = vector.load %arg5[%c0_13, %c0_14] : memref<1x384xf32, #tpu.memory_space<vmem>>, vector<1x384xf32>
    %29 = vector.broadcast %28 : vector<1x384xf32> to vector<8x384xf32>
    %30 = arith.addf %27, %29 : vector<8x384xf32>
    %31 = tpu.iota {dimensions = array<i32: 1>} : vector<1x8xi32>
    %c5_i32 = arith.constant 5 : i32
    %32 = vector.broadcast %c5_i32 : i32 to vector<1x8xi32>
    %33 = arith.cmpi slt, %31, %32 : vector<1x8xi32>
    %cst_15 = arith.constant 0.000000e+00 : f32
    %cst_16 = arith.constant -1.000000e+30 : f32
    %34 = vector.broadcast %cst_15 : f32 to vector<1x8xf32>
    %35 = vector.broadcast %cst_16 : f32 to vector<1x8xf32>
    %36 = arith.select %33, %34, %35 : vector<1x8xi1>, vector<1x8xf32>
    %37 = vector.extract_strided_slice %30 {offsets = [0, 0], sizes = [8, 32], strides = [1, 1]} : vector<8x384xf32> to vector<8x32xf32>
    %cst_17 = arith.constant 0.176776692 : f32
    %38 = vector.broadcast %cst_17 : f32 to vector<8x32xf32>
    %39 = arith.mulf %37, %38 : vector<8x32xf32>
    %40 = arith.truncf %39 : vector<8x32xf32> to vector<8x32xbf16>
    %41 = vector.extract_strided_slice %30 {offsets = [0, 128], sizes = [8, 32], strides = [1, 1]} : vector<8x384xf32> to vector<8x32xf32>
    %42 = arith.truncf %41 : vector<8x32xf32> to vector<8x32xbf16>
    %43 = vector.extract_strided_slice %30 {offsets = [0, 256], sizes = [8, 32], strides = [1, 1]} : vector<8x384xf32> to vector<8x32xf32>
    %44 = arith.truncf %43 : vector<8x32xf32> to vector<8x32xbf16>
    %cst_18 = arith.constant dense<0.000000e+00> : vector<8x8xf32>
    %45 = tpu.matmul %40, %42, %cst_18 {dimension_numbers = #tpu.dot_dimension_numbers<[1], [1], [0], [0], [0, 0, 1, 0], [], []>} : vector<8x32xbf16>, vector<8x32xbf16>, vector<8x8xf32> -> vector<8x8xf32>
    %46 = vector.broadcast %36 : vector<1x8xf32> to vector<8x8xf32>
    %47 = arith.addf %45, %46 : vector<8x8xf32>
    %cst_19 = arith.constant dense<0xFF800000> : vector<8xf32>
    %48 = vector.multi_reduction <maximumf>, %47, %cst_19 [1] : vector<8x8xf32> to vector<8xf32>
    %49 = vector.shape_cast %48 : vector<8xf32> to vector<8x1xf32>
    %50 = vector.broadcast %49 : vector<8x1xf32> to vector<8x8xf32>
    %51 = arith.subf %47, %50 : vector<8x8xf32>
    %52 = math.exp %51 : vector<8x8xf32>
    %cst_20 = arith.constant dense<0.000000e+00> : vector<8xf32>
    %53 = vector.multi_reduction <add>, %52, %cst_20 [1] : vector<8x8xf32> to vector<8xf32>
    %54 = vector.shape_cast %53 : vector<8xf32> to vector<8x1xf32>
    %55 = arith.truncf %52 : vector<8x8xf32> to vector<8x8xbf16>
    %cst_21 = arith.constant dense<0.000000e+00> : vector<8x32xf32>
    %56 = tpu.matmul %55, %44, %cst_21 {dimension_numbers = #tpu.dot_dimension_numbers<[1], [0], [0], [1], [0, 0, 1, 1], [], []>} : vector<8x8xbf16>, vector<8x32xbf16>, vector<8x32xf32> -> vector<8x32xf32>
    %57 = tpu.reciprocal %54 {approx = true} : vector<8x1xf32> -> vector<8x1xf32>
    %58 = vector.broadcast %57 : vector<8x1xf32> to vector<8x32xf32>
    %59 = arith.mulf %56, %58 : vector<8x32xf32>
    %60 = vector.extract_strided_slice %30 {offsets = [0, 32], sizes = [8, 32], strides = [1, 1]} : vector<8x384xf32> to vector<8x32xf32>
    %cst_22 = arith.constant 0.176776692 : f32
    %61 = vector.broadcast %cst_22 : f32 to vector<8x32xf32>
    %62 = arith.mulf %60, %61 : vector<8x32xf32>
    %63 = arith.truncf %62 : vector<8x32xf32> to vector<8x32xbf16>
    %64 = vector.extract_strided_slice %30 {offsets = [0, 160], sizes = [8, 32], strides = [1, 1]} : vector<8x384xf32> to vector<8x32xf32>
    %65 = arith.truncf %64 : vector<8x32xf32> to vector<8x32xbf16>
    %66 = vector.extract_strided_slice %30 {offsets = [0, 288], sizes = [8, 32], strides = [1, 1]} : vector<8x384xf32> to vector<8x32xf32>
    %67 = arith.truncf %66 : vector<8x32xf32> to vector<8x32xbf16>
    %cst_23 = arith.constant dense<0.000000e+00> : vector<8x8xf32>
    %68 = tpu.matmul %63, %65, %cst_23 {dimension_numbers = #tpu.dot_dimension_numbers<[1], [1], [0], [0], [0, 0, 1, 0], [], []>} : vector<8x32xbf16>, vector<8x32xbf16>, vector<8x8xf32> -> vector<8x8xf32>
    %69 = vector.broadcast %36 : vector<1x8xf32> to vector<8x8xf32>
    %70 = arith.addf %68, %69 : vector<8x8xf32>
    %cst_24 = arith.constant dense<0xFF800000> : vector<8xf32>
    %71 = vector.multi_reduction <maximumf>, %70, %cst_24 [1] : vector<8x8xf32> to vector<8xf32>
    %72 = vector.shape_cast %71 : vector<8xf32> to vector<8x1xf32>
    %73 = vector.broadcast %72 : vector<8x1xf32> to vector<8x8xf32>
    %74 = arith.subf %70, %73 : vector<8x8xf32>
    %75 = math.exp %74 : vector<8x8xf32>
    %cst_25 = arith.constant dense<0.000000e+00> : vector<8xf32>
    %76 = vector.multi_reduction <add>, %75, %cst_25 [1] : vector<8x8xf32> to vector<8xf32>
    %77 = vector.shape_cast %76 : vector<8xf32> to vector<8x1xf32>
    %78 = arith.truncf %75 : vector<8x8xf32> to vector<8x8xbf16>
    %cst_26 = arith.constant dense<0.000000e+00> : vector<8x32xf32>
    %79 = tpu.matmul %78, %67, %cst_26 {dimension_numbers = #tpu.dot_dimension_numbers<[1], [0], [0], [1], [0, 0, 1, 1], [], []>} : vector<8x8xbf16>, vector<8x32xbf16>, vector<8x32xf32> -> vector<8x32xf32>
    %80 = tpu.reciprocal %77 {approx = true} : vector<8x1xf32> -> vector<8x1xf32>
    %81 = vector.broadcast %80 : vector<8x1xf32> to vector<8x32xf32>
    %82 = arith.mulf %79, %81 : vector<8x32xf32>
    %83 = vector.extract_strided_slice %30 {offsets = [0, 64], sizes = [8, 32], strides = [1, 1]} : vector<8x384xf32> to vector<8x32xf32>
    %cst_27 = arith.constant 0.176776692 : f32
    %84 = vector.broadcast %cst_27 : f32 to vector<8x32xf32>
    %85 = arith.mulf %83, %84 : vector<8x32xf32>
    %86 = arith.truncf %85 : vector<8x32xf32> to vector<8x32xbf16>
    %87 = vector.extract_strided_slice %30 {offsets = [0, 192], sizes = [8, 32], strides = [1, 1]} : vector<8x384xf32> to vector<8x32xf32>
    %88 = arith.truncf %87 : vector<8x32xf32> to vector<8x32xbf16>
    %89 = vector.extract_strided_slice %30 {offsets = [0, 320], sizes = [8, 32], strides = [1, 1]} : vector<8x384xf32> to vector<8x32xf32>
    %90 = arith.truncf %89 : vector<8x32xf32> to vector<8x32xbf16>
    %cst_28 = arith.constant dense<0.000000e+00> : vector<8x8xf32>
    %91 = tpu.matmul %86, %88, %cst_28 {dimension_numbers = #tpu.dot_dimension_numbers<[1], [1], [0], [0], [0, 0, 1, 0], [], []>} : vector<8x32xbf16>, vector<8x32xbf16>, vector<8x8xf32> -> vector<8x8xf32>
    %92 = vector.broadcast %36 : vector<1x8xf32> to vector<8x8xf32>
    %93 = arith.addf %91, %92 : vector<8x8xf32>
    %cst_29 = arith.constant dense<0xFF800000> : vector<8xf32>
    %94 = vector.multi_reduction <maximumf>, %93, %cst_29 [1] : vector<8x8xf32> to vector<8xf32>
    %95 = vector.shape_cast %94 : vector<8xf32> to vector<8x1xf32>
    %96 = vector.broadcast %95 : vector<8x1xf32> to vector<8x8xf32>
    %97 = arith.subf %93, %96 : vector<8x8xf32>
    %98 = math.exp %97 : vector<8x8xf32>
    %cst_30 = arith.constant dense<0.000000e+00> : vector<8xf32>
    %99 = vector.multi_reduction <add>, %98, %cst_30 [1] : vector<8x8xf32> to vector<8xf32>
    %100 = vector.shape_cast %99 : vector<8xf32> to vector<8x1xf32>
    %101 = arith.truncf %98 : vector<8x8xf32> to vector<8x8xbf16>
    %cst_31 = arith.constant dense<0.000000e+00> : vector<8x32xf32>
    %102 = tpu.matmul %101, %90, %cst_31 {dimension_numbers = #tpu.dot_dimension_numbers<[1], [0], [0], [1], [0, 0, 1, 1], [], []>} : vector<8x8xbf16>, vector<8x32xbf16>, vector<8x32xf32> -> vector<8x32xf32>
    %103 = tpu.reciprocal %100 {approx = true} : vector<8x1xf32> -> vector<8x1xf32>
    %104 = vector.broadcast %103 : vector<8x1xf32> to vector<8x32xf32>
    %105 = arith.mulf %102, %104 : vector<8x32xf32>
    %106 = vector.extract_strided_slice %30 {offsets = [0, 96], sizes = [8, 32], strides = [1, 1]} : vector<8x384xf32> to vector<8x32xf32>
    %cst_32 = arith.constant 0.176776692 : f32
    %107 = vector.broadcast %cst_32 : f32 to vector<8x32xf32>
    %108 = arith.mulf %106, %107 : vector<8x32xf32>
    %109 = arith.truncf %108 : vector<8x32xf32> to vector<8x32xbf16>
    %110 = vector.extract_strided_slice %30 {offsets = [0, 224], sizes = [8, 32], strides = [1, 1]} : vector<8x384xf32> to vector<8x32xf32>
    %111 = arith.truncf %110 : vector<8x32xf32> to vector<8x32xbf16>
    %112 = vector.extract_strided_slice %30 {offsets = [0, 352], sizes = [8, 32], strides = [1, 1]} : vector<8x384xf32> to vector<8x32xf32>
    %113 = arith.truncf %112 : vector<8x32xf32> to vector<8x32xbf16>
    %cst_33 = arith.constant dense<0.000000e+00> : vector<8x8xf32>
    %114 = tpu.matmul %109, %111, %cst_33 {dimension_numbers = #tpu.dot_dimension_numbers<[1], [1], [0], [0], [0, 0, 1, 0], [], []>} : vector<8x32xbf16>, vector<8x32xbf16>, vector<8x8xf32> -> vector<8x8xf32>
    %115 = vector.broadcast %36 : vector<1x8xf32> to vector<8x8xf32>
    %116 = arith.addf %114, %115 : vector<8x8xf32>
    %cst_34 = arith.constant dense<0xFF800000> : vector<8xf32>
    %117 = vector.multi_reduction <maximumf>, %116, %cst_34 [1] : vector<8x8xf32> to vector<8xf32>
    %118 = vector.shape_cast %117 : vector<8xf32> to vector<8x1xf32>
    %119 = vector.broadcast %118 : vector<8x1xf32> to vector<8x8xf32>
    %120 = arith.subf %116, %119 : vector<8x8xf32>
    %121 = math.exp %120 : vector<8x8xf32>
    %cst_35 = arith.constant dense<0.000000e+00> : vector<8xf32>
    %122 = vector.multi_reduction <add>, %121, %cst_35 [1] : vector<8x8xf32> to vector<8xf32>
    %123 = vector.shape_cast %122 : vector<8xf32> to vector<8x1xf32>
    %124 = arith.truncf %121 : vector<8x8xf32> to vector<8x8xbf16>
    %cst_36 = arith.constant dense<0.000000e+00> : vector<8x32xf32>
    %125 = tpu.matmul %124, %113, %cst_36 {dimension_numbers = #tpu.dot_dimension_numbers<[1], [0], [0], [1], [0, 0, 1, 1], [], []>} : vector<8x8xbf16>, vector<8x32xbf16>, vector<8x32xf32> -> vector<8x32xf32>
    %126 = tpu.reciprocal %123 {approx = true} : vector<8x1xf32> -> vector<8x1xf32>
    %127 = vector.broadcast %126 : vector<8x1xf32> to vector<8x32xf32>
    %128 = arith.mulf %125, %127 : vector<8x32xf32>
    %129 = tpu.concatenate %59, %82, %105, %128 in 1 : vector<8x32xf32>, vector<8x32xf32>, vector<8x32xf32>, vector<8x32xf32> -> vector<8x128xf32>
    %130 = arith.truncf %129 : vector<8x128xf32> to vector<8x128xbf16>
    %c0_37 = arith.constant 0 : index
    %c0_38 = arith.constant 0 : index
    %131 = vector.load %arg6[%c0_37, %c0_38] : memref<128x128xbf16, #tpu.memory_space<vmem>>, vector<128x128xbf16>
    %cst_39 = arith.constant dense<0.000000e+00> : vector<8x128xf32>
    %132 = tpu.matmul %130, %131, %cst_39 {dimension_numbers = #tpu.dot_dimension_numbers<[1], [0], [0], [1], [0, 0, 1, 1], [], []>} : vector<8x128xbf16>, vector<128x128xbf16>, vector<8x128xf32> -> vector<8x128xf32>
    %133 = arith.addf %2, %132 : vector<8x128xf32>
    %c0_40 = arith.constant 0 : index
    %c0_41 = arith.constant 0 : index
    %134 = vector.load %arg7[%c0_40, %c0_41] : memref<1x128xf32, #tpu.memory_space<vmem>>, vector<1x128xf32>
    %135 = vector.broadcast %134 : vector<1x128xf32> to vector<8x128xf32>
    %136 = arith.addf %133, %135 : vector<8x128xf32>
    %137 = arith.truncf %136 : vector<8x128xf32> to vector<8x128xbf16>
    %c0_42 = arith.constant 0 : index
    %c0_43 = arith.constant 0 : index
    %c0_44 = arith.constant 0 : index
    %138 = vector.load %arg8[%c0_42, %c0_43, %c0_44] : memref<1x8x128xbf16, #tpu.memory_space<vmem>>, vector<1x8x128xbf16>
    %139 = vector.shape_cast %138 : vector<1x8x128xbf16> to vector<8x128xbf16>
    %140 = vector.shape_cast %137 : vector<8x128xbf16> to vector<1x8x128xbf16>
    tpu.vector_store %arg8[%c0_42, %c0_43, %c0_44], %140 {strides = array<i32>} : memref<1x8x128xbf16, #tpu.memory_space<vmem>>, vector<1x8x128xbf16>,
    return
  }
  func.func @transform_0(%arg0: i32) -> (i32, i32, i32) {
    %c0_i32 = arith.constant 0 : i32
    %c0_i32_0 = arith.constant 0 : i32
    %c0_i32_1 = arith.constant 0 : i32
    return %arg0, %c0_i32, %c0_i32_0 : i32, i32, i32
  }
  func.func @transform_1(%arg0: i32) -> (i32, i32) {
    %c0_i32 = arith.constant 0 : i32
    %c0_i32_0 = arith.constant 0 : i32
    %c0_i32_1 = arith.constant 0 : i32
    return %c0_i32, %c0_i32_0 : i32, i32
  }
  func.func @transform_2(%arg0: i32) -> (i32, i32) {
    %c0_i32 = arith.constant 0 : i32
    %c0_i32_0 = arith.constant 0 : i32
    %c0_i32_1 = arith.constant 0 : i32
    return %c0_i32, %c0_i32_0 : i32, i32
  }
  func.func @transform_3(%arg0: i32) -> (i32, i32) {
    %c0_i32 = arith.constant 0 : i32
    %c0_i32_0 = arith.constant 0 : i32
    %c0_i32_1 = arith.constant 0 : i32
    return %c0_i32, %c0_i32_0 : i32, i32
  }
  func.func @transform_4(%arg0: i32) -> (i32, i32) {
    %c0_i32 = arith.constant 0 : i32
    %c0_i32_0 = arith.constant 0 : i32
    %c0_i32_1 = arith.constant 0 : i32
    return %c0_i32, %c0_i32_0 : i32, i32
  }
  func.func @transform_5(%arg0: i32) -> (i32, i32) {
    %c0_i32 = arith.constant 0 : i32
    %c0_i32_0 = arith.constant 0 : i32
    %c0_i32_1 = arith.constant 0 : i32
    return %c0_i32, %c0_i32_0 : i32, i32
  }
  func.func @transform_6(%arg0: i32) -> (i32, i32) {
    %c0_i32 = arith.constant 0 : i32
    %c0_i32_0 = arith.constant 0 : i32
    %c0_i32_1 = arith.constant 0 : i32
    return %c0_i32, %c0_i32_0 : i32, i32
  }
  func.func @transform_7(%arg0: i32) -> (i32, i32, i32) {
    %c0_i32 = arith.constant 0 : i32
    %c0_i32_0 = arith.constant 0 : i32
    %c0_i32_1 = arith.constant 0 : i32
    return %arg0, %c0_i32, %c0_i32_0 : i32, i32, i32
  }
}

module attributes {stable_mosaic.version = 11 : i64} {
  func.func @_ff_block_kernel(%arg0: i32, %arg1: memref<16x128xbf16, #tpu.memory_space<vmem>>, %arg2: memref<1x128xf32, #tpu.memory_space<vmem>>, %arg3: memref<1x128xf32, #tpu.memory_space<vmem>>, %arg4: memref<128x256xbf16, #tpu.memory_space<vmem>>, %arg5: memref<1x256xf32, #tpu.memory_space<vmem>>, %arg6: memref<256x128xbf16, #tpu.memory_space<vmem>>, %arg7: memref<1x128xf32, #tpu.memory_space<vmem>>, %arg8: memref<16x128xbf16, #tpu.memory_space<vmem>>) attributes {dimension_semantics = [#tpu.dimension_semantics<parallel>], iteration_bounds = array<i64: 1>, scalar_prefetch = 0 : i64, scratch_operands = 0 : i64, tpu.core_type = #tpu.core_type<tc>, window_params = [{transform_indices = @transform_0, window_bounds = array<i64: 16, 128>}, {pipeline_mode = #tpu.pipeline_mode<synchronous>, transform_indices = @transform_1, window_bounds = array<i64: 1, 128>}, {pipeline_mode = #tpu.pipeline_mode<synchronous>, transform_indices = @transform_2, window_bounds = array<i64: 1, 128>}, {pipeline_mode = #tpu.pipeline_mode<synchronous>, transform_indices = @transform_3, window_bounds = array<i64: 128, 256>}, {pipeline_mode = #tpu.pipeline_mode<synchronous>, transform_indices = @transform_4, window_bounds = array<i64: 1, 256>}, {pipeline_mode = #tpu.pipeline_mode<synchronous>, transform_indices = @transform_5, window_bounds = array<i64: 256, 128>}, {pipeline_mode = #tpu.pipeline_mode<synchronous>, transform_indices = @transform_6, window_bounds = array<i64: 1, 128>}, {transform_indices = @transform_7, window_bounds = array<i64: 16, 128>}]} {
    %c0 = arith.constant 0 : index
    %c0_0 = arith.constant 0 : index
    %0 = vector.load %arg1[%c0, %c0_0] : memref<16x128xbf16, #tpu.memory_space<vmem>>, vector<16x128xbf16>
    %1 = arith.extf %0 : vector<16x128xbf16> to vector<16x128xf32>
    %c0_1 = arith.constant 0 : index
    %c0_2 = arith.constant 0 : index
    %2 = vector.load %arg2[%c0_1, %c0_2] : memref<1x128xf32, #tpu.memory_space<vmem>>, vector<1x128xf32>
    %c0_3 = arith.constant 0 : index
    %c0_4 = arith.constant 0 : index
    %3 = vector.load %arg3[%c0_3, %c0_4] : memref<1x128xf32, #tpu.memory_space<vmem>>, vector<1x128xf32>
    %cst = arith.constant dense<0.000000e+00> : vector<16xf32>
    %4 = vector.multi_reduction <add>, %1, %cst [1] : vector<16x128xf32> to vector<16xf32>
    %5 = vector.shape_cast %4 : vector<16xf32> to vector<16x1xf32>
    %cst_5 = arith.constant 1.280000e+02 : f32
    %6 = vector.broadcast %cst_5 : f32 to vector<16x1xf32>
    %7 = arith.divf %5, %6 : vector<16x1xf32>
    %8 = vector.broadcast %7 : vector<16x1xf32> to vector<16x128xf32>
    %9 = arith.subf %1, %8 : vector<16x128xf32>
    %10 = arith.mulf %9, %9 : vector<16x128xf32>
    %cst_6 = arith.constant dense<0.000000e+00> : vector<16xf32>
    %11 = vector.multi_reduction <add>, %10, %cst_6 [1] : vector<16x128xf32> to vector<16xf32>
    %12 = vector.shape_cast %11 : vector<16xf32> to vector<16x1xf32>
    %cst_7 = arith.constant 1.280000e+02 : f32
    %13 = vector.broadcast %cst_7 : f32 to vector<16x1xf32>
    %14 = arith.divf %12, %13 : vector<16x1xf32>
    %cst_8 = arith.constant 9.99999974E-6 : f32
    %15 = vector.broadcast %cst_8 : f32 to vector<16x1xf32>
    %16 = arith.addf %14, %15 : vector<16x1xf32>
    %17 = math.rsqrt %16 : vector<16x1xf32>
    %18 = vector.broadcast %17 : vector<16x1xf32> to vector<16x128xf32>
    %19 = arith.mulf %9, %18 : vector<16x128xf32>
    %20 = vector.broadcast %2 : vector<1x128xf32> to vector<16x128xf32>
    %21 = arith.mulf %19, %20 : vector<16x128xf32>
    %22 = vector.broadcast %3 : vector<1x128xf32> to vector<16x128xf32>
    %23 = arith.addf %21, %22 : vector<16x128xf32>
    %24 = arith.truncf %23 : vector<16x128xf32> to vector<16x128xbf16>
    %c0_9 = arith.constant 0 : index
    %c0_10 = arith.constant 0 : index
    %25 = vector.load %arg4[%c0_9, %c0_10] : memref<128x256xbf16, #tpu.memory_space<vmem>>, vector<128x256xbf16>
    %cst_11 = arith.constant dense<0.000000e+00> : vector<16x256xf32>
    %26 = tpu.matmul %24, %25, %cst_11 {dimension_numbers = #tpu.dot_dimension_numbers<[1], [0], [0], [1], [0, 0, 1, 1], [], []>} : vector<16x128xbf16>, vector<128x256xbf16>, vector<16x256xf32> -> vector<16x256xf32>
    %c0_12 = arith.constant 0 : index
    %c0_13 = arith.constant 0 : index
    %27 = vector.load %arg5[%c0_12, %c0_13] : memref<1x256xf32, #tpu.memory_space<vmem>>, vector<1x256xf32>
    %28 = vector.broadcast %27 : vector<1x256xf32> to vector<16x256xf32>
    %29 = arith.addf %26, %28 : vector<16x256xf32>
    %cst_14 = arith.constant 5.000000e-01 : f32
    %30 = vector.broadcast %cst_14 : f32 to vector<16x256xf32>
    %31 = arith.mulf %30, %29 : vector<16x256xf32>
    %cst_15 = arith.constant 0.707106769 : f32
    %32 = vector.broadcast %cst_15 : f32 to vector<16x256xf32>
    %33 = arith.mulf %29, %32 : vector<16x256xf32>
    %34 = math.absf %33 : vector<16x256xf32>
    %cst_16 = arith.constant 0.327591091 : f32
    %35 = vector.broadcast %cst_16 : f32 to vector<16x256xf32>
    %36 = arith.mulf %35, %34 : vector<16x256xf32>
    %cst_17 = arith.constant 1.000000e+00 : f32
    %37 = vector.broadcast %cst_17 : f32 to vector<16x256xf32>
    %38 = arith.addf %37, %36 : vector<16x256xf32>
    %cst_18 = arith.constant 1.000000e+00 : f32
    %39 = vector.broadcast %cst_18 : f32 to vector<16x256xf32>
    %40 = arith.divf %39, %38 : vector<16x256xf32>
    %cst_19 = arith.constant 1.06140542 : f32
    %41 = vector.broadcast %cst_19 : f32 to vector<16x256xf32>
    %42 = arith.mulf %40, %41 : vector<16x256xf32>
    %cst_20 = arith.constant -1.45315206 : f32
    %43 = vector.broadcast %cst_20 : f32 to vector<16x256xf32>
    %44 = arith.addf %43, %42 : vector<16x256xf32>
    %45 = arith.mulf %40, %44 : vector<16x256xf32>
    %cst_21 = arith.constant 1.42141378 : f32
    %46 = vector.broadcast %cst_21 : f32 to vector<16x256xf32>
    %47 = arith.addf %46, %45 : vector<16x256xf32>
    %48 = arith.mulf %40, %47 : vector<16x256xf32>
    %cst_22 = arith.constant -0.284496725 : f32
    %49 = vector.broadcast %cst_22 : f32 to vector<16x256xf32>
    %50 = arith.addf %49, %48 : vector<16x256xf32>
    %51 = arith.mulf %40, %50 : vector<16x256xf32>
    %cst_23 = arith.constant 0.254829586 : f32
    %52 = vector.broadcast %cst_23 : f32 to vector<16x256xf32>
    %53 = arith.addf %52, %51 : vector<16x256xf32>
    %54 = arith.mulf %40, %53 : vector<16x256xf32>
    %cst_24 = arith.constant 0.000000e+00 : f32
    %55 = vector.broadcast %cst_24 : f32 to vector<16x256xf32>
    %56 = arith.subf %55, %34 : vector<16x256xf32>
    %57 = arith.mulf %56, %34 : vector<16x256xf32>
    %58 = math.exp %57 : vector<16x256xf32>
    %59 = arith.mulf %54, %58 : vector<16x256xf32>
    %cst_25 = arith.constant 1.000000e+00 : f32
    %60 = vector.broadcast %cst_25 : f32 to vector<16x256xf32>
    %61 = arith.subf %60, %59 : vector<16x256xf32>
    %cst_26 = arith.constant 0.000000e+00 : f32
    %62 = vector.broadcast %cst_26 : f32 to vector<16x256xf32>
    %63 = arith.cmpf oge, %33, %62 : vector<16x256xf32>
    %cst_27 = arith.constant 0.000000e+00 : f32
    %64 = vector.broadcast %cst_27 : f32 to vector<16x256xf32>
    %65 = arith.subf %64, %61 : vector<16x256xf32>
    %66 = arith.select %63, %61, %65 : vector<16x256xi1>, vector<16x256xf32>
    %cst_28 = arith.constant 1.000000e+00 : f32
    %67 = vector.broadcast %cst_28 : f32 to vector<16x256xf32>
    %68 = arith.addf %67, %66 : vector<16x256xf32>
    %69 = arith.mulf %31, %68 : vector<16x256xf32>
    %70 = arith.truncf %69 : vector<16x256xf32> to vector<16x256xbf16>
    %c0_29 = arith.constant 0 : index
    %c0_30 = arith.constant 0 : index
    %71 = vector.load %arg6[%c0_29, %c0_30] : memref<256x128xbf16, #tpu.memory_space<vmem>>, vector<256x128xbf16>
    %cst_31 = arith.constant dense<0.000000e+00> : vector<16x128xf32>
    %72 = tpu.matmul %70, %71, %cst_31 {dimension_numbers = #tpu.dot_dimension_numbers<[1], [0], [0], [1], [0, 0, 1, 1], [], []>} : vector<16x256xbf16>, vector<256x128xbf16>, vector<16x128xf32> -> vector<16x128xf32>
    %c0_32 = arith.constant 0 : index
    %c0_33 = arith.constant 0 : index
    %73 = vector.load %arg7[%c0_32, %c0_33] : memref<1x128xf32, #tpu.memory_space<vmem>>, vector<1x128xf32>
    %74 = vector.broadcast %73 : vector<1x128xf32> to vector<16x128xf32>
    %75 = arith.addf %72, %74 : vector<16x128xf32>
    %76 = arith.addf %1, %75 : vector<16x128xf32>
    %77 = arith.truncf %76 : vector<16x128xf32> to vector<16x128xbf16>
    %c0_34 = arith.constant 0 : index
    %c0_35 = arith.constant 0 : index
    %78 = vector.load %arg8[%c0_34, %c0_35] : memref<16x128xbf16, #tpu.memory_space<vmem>>, vector<16x128xbf16>
    tpu.vector_store %arg8[%c0_34, %c0_35], %77 {strides = array<i32>} : memref<16x128xbf16, #tpu.memory_space<vmem>>, vector<16x128xbf16>,
    return
  }
  func.func @transform_0(%arg0: i32) -> (i32, i32) {
    %c0_i32 = arith.constant 0 : i32
    %c0_i32_0 = arith.constant 0 : i32
    return %arg0, %c0_i32 : i32, i32
  }
  func.func @transform_1(%arg0: i32) -> (i32, i32) {
    %c0_i32 = arith.constant 0 : i32
    %c0_i32_0 = arith.constant 0 : i32
    %c0_i32_1 = arith.constant 0 : i32
    return %c0_i32, %c0_i32_0 : i32, i32
  }
  func.func @transform_2(%arg0: i32) -> (i32, i32) {
    %c0_i32 = arith.constant 0 : i32
    %c0_i32_0 = arith.constant 0 : i32
    %c0_i32_1 = arith.constant 0 : i32
    return %c0_i32, %c0_i32_0 : i32, i32
  }
  func.func @transform_3(%arg0: i32) -> (i32, i32) {
    %c0_i32 = arith.constant 0 : i32
    %c0_i32_0 = arith.constant 0 : i32
    %c0_i32_1 = arith.constant 0 : i32
    return %c0_i32, %c0_i32_0 : i32, i32
  }
  func.func @transform_4(%arg0: i32) -> (i32, i32) {
    %c0_i32 = arith.constant 0 : i32
    %c0_i32_0 = arith.constant 0 : i32
    %c0_i32_1 = arith.constant 0 : i32
    return %c0_i32, %c0_i32_0 : i32, i32
  }
  func.func @transform_5(%arg0: i32) -> (i32, i32) {
    %c0_i32 = arith.constant 0 : i32
    %c0_i32_0 = arith.constant 0 : i32
    %c0_i32_1 = arith.constant 0 : i32
    return %c0_i32, %c0_i32_0 : i32, i32
  }
  func.func @transform_6(%arg0: i32) -> (i32, i32) {
    %c0_i32 = arith.constant 0 : i32
    %c0_i32_0 = arith.constant 0 : i32
    %c0_i32_1 = arith.constant 0 : i32
    return %c0_i32, %c0_i32_0 : i32, i32
  }
  func.func @transform_7(%arg0: i32) -> (i32, i32) {
    %c0_i32 = arith.constant 0 : i32
    %c0_i32_0 = arith.constant 0 : i32
    return %arg0, %c0_i32 : i32, i32
  }
}

module attributes {stable_mosaic.version = 11 : i64} {
  func.func @_head_kernel(%arg0: i32, %arg1: memref<2x8x128xbf16, #tpu.memory_space<vmem>>, %arg2: memref<1x128xf32, #tpu.memory_space<vmem>>, %arg3: memref<1x128xf32, #tpu.memory_space<vmem>>, %arg4: memref<128x128xbf16, #tpu.memory_space<vmem>>, %arg5: memref<1x128xf32, #tpu.memory_space<vmem>>, %arg6: memref<128x16xbf16, #tpu.memory_space<vmem>>, %arg7: memref<1x16xf32, #tpu.memory_space<vmem>>, %arg8: memref<2x16xf32, #tpu.memory_space<vmem>>) attributes {dimension_semantics = [#tpu.dimension_semantics<arbitrary>], iteration_bounds = array<i64: 1>, scalar_prefetch = 0 : i64, scratch_operands = 0 : i64, tpu.core_type = #tpu.core_type<tc>, window_params = [{pipeline_mode = #tpu.pipeline_mode<synchronous>, transform_indices = @transform_0, window_bounds = array<i64: 2, 8, 128>}, {pipeline_mode = #tpu.pipeline_mode<synchronous>, transform_indices = @transform_1, window_bounds = array<i64: 1, 128>}, {pipeline_mode = #tpu.pipeline_mode<synchronous>, transform_indices = @transform_2, window_bounds = array<i64: 1, 128>}, {pipeline_mode = #tpu.pipeline_mode<synchronous>, transform_indices = @transform_3, window_bounds = array<i64: 128, 128>}, {pipeline_mode = #tpu.pipeline_mode<synchronous>, transform_indices = @transform_4, window_bounds = array<i64: 1, 128>}, {pipeline_mode = #tpu.pipeline_mode<synchronous>, transform_indices = @transform_5, window_bounds = array<i64: 128, 16>}, {pipeline_mode = #tpu.pipeline_mode<synchronous>, transform_indices = @transform_6, window_bounds = array<i64: 1, 16>}, {pipeline_mode = #tpu.pipeline_mode<synchronous>, transform_indices = @transform_7, window_bounds = array<i64: 2, 16>}]} {
    %c0 = arith.constant 0 : index
    %c0_0 = arith.constant 0 : index
    %c0_1 = arith.constant 0 : index
    %0 = vector.load %arg1[%c0, %c0_0, %c0_1] : memref<2x8x128xbf16, #tpu.memory_space<vmem>>, vector<2x1x128xbf16>
    %1 = vector.shape_cast %0 : vector<2x1x128xbf16> to vector<2x128xbf16>
    %2 = arith.extf %1 : vector<2x128xbf16> to vector<2x128xf32>
    %c0_2 = arith.constant 0 : index
    %c0_3 = arith.constant 0 : index
    %3 = vector.load %arg2[%c0_2, %c0_3] : memref<1x128xf32, #tpu.memory_space<vmem>>, vector<1x128xf32>
    %c0_4 = arith.constant 0 : index
    %c0_5 = arith.constant 0 : index
    %4 = vector.load %arg3[%c0_4, %c0_5] : memref<1x128xf32, #tpu.memory_space<vmem>>, vector<1x128xf32>
    %cst = arith.constant dense<0.000000e+00> : vector<2xf32>
    %5 = vector.multi_reduction <add>, %2, %cst [1] : vector<2x128xf32> to vector<2xf32>
    %6 = vector.shape_cast %5 : vector<2xf32> to vector<2x1xf32>
    %cst_6 = arith.constant 1.280000e+02 : f32
    %7 = vector.broadcast %cst_6 : f32 to vector<2x1xf32>
    %8 = arith.divf %6, %7 : vector<2x1xf32>
    %9 = vector.broadcast %8 : vector<2x1xf32> to vector<2x128xf32>
    %10 = arith.subf %2, %9 : vector<2x128xf32>
    %11 = arith.mulf %10, %10 : vector<2x128xf32>
    %cst_7 = arith.constant dense<0.000000e+00> : vector<2xf32>
    %12 = vector.multi_reduction <add>, %11, %cst_7 [1] : vector<2x128xf32> to vector<2xf32>
    %13 = vector.shape_cast %12 : vector<2xf32> to vector<2x1xf32>
    %cst_8 = arith.constant 1.280000e+02 : f32
    %14 = vector.broadcast %cst_8 : f32 to vector<2x1xf32>
    %15 = arith.divf %13, %14 : vector<2x1xf32>
    %cst_9 = arith.constant 9.99999974E-6 : f32
    %16 = vector.broadcast %cst_9 : f32 to vector<2x1xf32>
    %17 = arith.addf %15, %16 : vector<2x1xf32>
    %18 = math.rsqrt %17 : vector<2x1xf32>
    %19 = vector.broadcast %18 : vector<2x1xf32> to vector<2x128xf32>
    %20 = arith.mulf %10, %19 : vector<2x128xf32>
    %21 = vector.broadcast %3 : vector<1x128xf32> to vector<2x128xf32>
    %22 = arith.mulf %20, %21 : vector<2x128xf32>
    %23 = vector.broadcast %4 : vector<1x128xf32> to vector<2x128xf32>
    %24 = arith.addf %22, %23 : vector<2x128xf32>
    %25 = arith.truncf %24 : vector<2x128xf32> to vector<2x128xbf16>
    %c0_10 = arith.constant 0 : index
    %c0_11 = arith.constant 0 : index
    %26 = vector.load %arg4[%c0_10, %c0_11] : memref<128x128xbf16, #tpu.memory_space<vmem>>, vector<128x128xbf16>
    %cst_12 = arith.constant dense<0.000000e+00> : vector<2x128xf32>
    %27 = tpu.matmul %25, %26, %cst_12 {dimension_numbers = #tpu.dot_dimension_numbers<[1], [0], [0], [1], [0, 0, 1, 1], [], []>} : vector<2x128xbf16>, vector<128x128xbf16>, vector<2x128xf32> -> vector<2x128xf32>
    %c0_13 = arith.constant 0 : index
    %c0_14 = arith.constant 0 : index
    %28 = vector.load %arg5[%c0_13, %c0_14] : memref<1x128xf32, #tpu.memory_space<vmem>>, vector<1x128xf32>
    %29 = vector.broadcast %28 : vector<1x128xf32> to vector<2x128xf32>
    %30 = arith.addf %27, %29 : vector<2x128xf32>
    %31 = arith.truncf %30 : vector<2x128xf32> to vector<2x128xbf16>
    %c0_15 = arith.constant 0 : index
    %c0_16 = arith.constant 0 : index
    %32 = vector.load %arg6[%c0_15, %c0_16] : memref<128x16xbf16, #tpu.memory_space<vmem>>, vector<128x16xbf16>
    %cst_17 = arith.constant dense<0.000000e+00> : vector<2x16xf32>
    %33 = tpu.matmul %31, %32, %cst_17 {dimension_numbers = #tpu.dot_dimension_numbers<[1], [0], [0], [1], [0, 0, 1, 1], [], []>} : vector<2x128xbf16>, vector<128x16xbf16>, vector<2x16xf32> -> vector<2x16xf32>
    %c0_18 = arith.constant 0 : index
    %c0_19 = arith.constant 0 : index
    %34 = vector.load %arg7[%c0_18, %c0_19] : memref<1x16xf32, #tpu.memory_space<vmem>>, vector<1x16xf32>
    %35 = vector.broadcast %34 : vector<1x16xf32> to vector<2x16xf32>
    %36 = arith.addf %33, %35 : vector<2x16xf32>
    %c0_20 = arith.constant 0 : index
    %c0_21 = arith.constant 0 : index
    %37 = vector.load %arg8[%c0_20, %c0_21] : memref<2x16xf32, #tpu.memory_space<vmem>>, vector<2x16xf32>
    tpu.vector_store %arg8[%c0_20, %c0_21], %36 {strides = array<i32>} : memref<2x16xf32, #tpu.memory_space<vmem>>, vector<2x16xf32>,
    return
  }
  func.func @transform_0(%arg0: i32) -> (i32, i32, i32) {
    %c0_i32 = arith.constant 0 : i32
    %c0_i32_0 = arith.constant 0 : i32
    %c0_i32_1 = arith.constant 0 : i32
    %c0_i32_2 = arith.constant 0 : i32
    return %c0_i32, %c0_i32_0, %c0_i32_1 : i32, i32, i32
  }
  func.func @transform_1(%arg0: i32) -> (i32, i32) {
    %c0_i32 = arith.constant 0 : i32
    %c0_i32_0 = arith.constant 0 : i32
    %c0_i32_1 = arith.constant 0 : i32
    return %c0_i32, %c0_i32_0 : i32, i32
  }
  func.func @transform_2(%arg0: i32) -> (i32, i32) {
    %c0_i32 = arith.constant 0 : i32
    %c0_i32_0 = arith.constant 0 : i32
    %c0_i32_1 = arith.constant 0 : i32
    return %c0_i32, %c0_i32_0 : i32, i32
  }
  func.func @transform_3(%arg0: i32) -> (i32, i32) {
    %c0_i32 = arith.constant 0 : i32
    %c0_i32_0 = arith.constant 0 : i32
    %c0_i32_1 = arith.constant 0 : i32
    return %c0_i32, %c0_i32_0 : i32, i32
  }
  func.func @transform_4(%arg0: i32) -> (i32, i32) {
    %c0_i32 = arith.constant 0 : i32
    %c0_i32_0 = arith.constant 0 : i32
    %c0_i32_1 = arith.constant 0 : i32
    return %c0_i32, %c0_i32_0 : i32, i32
  }
  func.func @transform_5(%arg0: i32) -> (i32, i32) {
    %c0_i32 = arith.constant 0 : i32
    %c0_i32_0 = arith.constant 0 : i32
    %c0_i32_1 = arith.constant 0 : i32
    return %c0_i32, %c0_i32_0 : i32, i32
  }
  func.func @transform_6(%arg0: i32) -> (i32, i32) {
    %c0_i32 = arith.constant 0 : i32
    %c0_i32_0 = arith.constant 0 : i32
    %c0_i32_1 = arith.constant 0 : i32
    return %c0_i32, %c0_i32_0 : i32, i32
  }
  func.func @transform_7(%arg0: i32) -> (i32, i32) {
    %c0_i32 = arith.constant 0 : i32
    %c0_i32_0 = arith.constant 0 : i32
    %c0_i32_1 = arith.constant 0 : i32
    return %c0_i32, %c0_i32_0 : i32, i32
  }
}

</mosaic_0001>

<bundles_post_ra>
// kernel: tpu_custom_call.1
= control target key start
LH: loop header
LB: loop body
LE: loop exit
PB: predicated region body
PF: predicated region fallthrough
CT: control target
= control target key end

     0   :  { %6 = vsyncpa [#allocation3], 0  ;;  %s103_s0 = inlined_call_operand.hbm [shape: f32[8,128], index: 0, kind: input, shape index: {}]   ;;  %s104_s1 = inlined_call_operand.hbm [shape: f32[8,128], index: 1, kind: output, shape index: {}]  }
   0x1   :  { %7 = vsyncpa [#allocation4], 0  ;;  %s85_s6 = smov [#allocation2]  }
   0x2   :  { %s14_s7 = sshll.u32 %s85_s6, 4  ;;  %s15_s7 = int_to_ptr.vmem [resolvable:$true] %s14_s7 }
   0x3   :  { %s49_s8 = scalar_lea.vmem %s15_s7, 128  ;;  %p54_p1 = scmp.lt.s32.totalorder %s15_s7, %s15_s7 }
   0x4   :  { %p50_p0 = scmp.ne.s32.totalorder %s15_s7, %s49_s8  ;;  %p55_p2 = scmp.lt.s32.totalorder %s49_s8, %s49_s8 }
   0x6   :  { %p56_p3 = por %p55_p2, %p54_p1 }
   0x8   :  { %p57_p4 = pnand %p56_p3, %p50_p0 }
   0xa   :  { %60 = shalt.err (!%p57_p4)
}
   0xb   :  { %17 = dma.hbm_to_vmem [thread:$0]  %s103_s0, 128, %s15_s7, [#allocation3]  }
   0xc   :  { %81 = dma.done.wait [#allocation3], 128  }
   0xd   :  { %82 = vsyncadd [#allocation3], 4294967168  ;;  %s86_s11 = smov [#allocation5]   ;;  %v21_v0 = vld [vmem:[#allocation2] sm:$0xff] }
   0xe   :  { %s30_s12 = sshll.u32 %s86_s11, 4  ;;  %v22_v1 = vmul.f32 2.0, %v21_v0  ;;  %s31_s12 = int_to_ptr.vmem [resolvable:$true] %s30_s12 }
   0xf   :  { %s61_s13 = scalar_lea.vmem %s31_s12, 128  ;;  %p66_p6 = scmp.lt.s32.totalorder %s31_s12, %s31_s12 }
  0x10   :  { %23 = vst [vmem:[#allocation5] sm:$0xff] %v22_v1  ;;  %p62_p5 = scmp.ne.s32.totalorder %s31_s12, %s61_s13  ;;  %p67_p7 = scmp.lt.s32.totalorder %s61_s13, %s61_s13 }
  0x12   :  { %p68_p8 = por %p67_p7, %p66_p6 }
  0x14   :  { %p69_p9 = pnand %p68_p8, %p62_p5 }
  0x16   :  { %72 = shalt.err (!%p69_p9)
}
  0x17   :  { %33 = dma.vmem_to_hbm [thread:$0]  %s31_s12, 128, %s104_s1, [#allocation4]  }
  0x18   :  { %83 = dma.done.wait [#allocation4], 128  }
  0x19   :  { %84 = vsyncadd [#allocation4], 4294967168 }
  0x1a   :  { %37 = vsyncpa [#allocation3], 1 }
  0x1b   :  { %38 = vsyncpa [#allocation4], 1 }

// kernel: vit_forward.6
= control target key start
LH: loop header
LB: loop body
LE: loop exit
PB: predicated region body
PF: predicated region fallthrough
CT: control target
= control target key end

     0   :  { %s589_s21 = smov 0   ;;  %s661_s0 = inlined_call_operand.vmem [shape: bf16[2,4,192], index: 0, kind: input, shape index: {}]   ;;  %s662_s1 = inlined_call_operand.vmem [shape: bf16[192,128], index: 1, kind: input, shape index: {}]   ;;  %s663_s2 = inlined_call_operand.vmem [shape: f32[1,128], index: 2, kind: input, shape index: {}]   ;;  %s664_s3 = inlined_call_operand.vmem [shape: f32[5,128], index: 3, kind: input, shape index: {}]   ;;  %s665_s4 = inlined_call_operand.vmem [shape: f32[1,128], index: 4, kind: input, shape index: {}]   ;;  %s666_s5 = inlined_call_operand.vmem [shape: f32[1,128], index: 5, kind: input, shape index: {}]   ;;  %s667_s6 = inlined_call_operand.vmem [shape: bf16[2,8,128], index: 6, kind: output, shape index: {}]  }
   0x1 LB: > { %s495_s22 = sadd.s32 4294967295, %s551_s21   ;;  %p499_p0 = scmp.ge.s32.totalorder %s551_s21, 1  ;;  %s551_s21 = sphi %s589_s21, %s16_s21  }
   0x2   : > { %p212_p1 = scmp.lt.s32.totalorder %s551_s21, 3 }
   0x4   : > { %p213_p2 = pnand %p499_p0, %p212_p1 }
   0x5   : > { %p241_p3 = scmp.lt.s32.totalorder (!%p213_p2), %s495_s22, 1 }
   0x6   : > { %216 = sbr.rel (%p213_p2) target bundleno = 568 (0x238), region = 44 }
   0xb   : > { %v531_v0 = vld [vmem:[%s662_s1 + $0x38] sm:$0xff]   ;;  %v553_v1 = vmov 0   ;;  %v532_v2 = vld [vmem:[%s662_s1 + $0x30] sm:$0xff]   ;;  %s669_s22 = smov (!%p241_p3, %s495_s22), 1  ;;  %v533_v3 = vld [vmem:[%s662_s1 + $0x28] sm:$0xff]   ;;  %vm358_vm0 = vcmask 523264  }
   0xc   : > { %362 = vmatprep.subr.bf16.mxu0 %v553_v1  ;;  %s521_s29 = sshll.u32 %s669_s22, 2  ;;  %v534_v4 = vld [vmem:[%s662_s1 + $0x20] sm:$0xff]   ;;  %v535_v7 = vld [vmem:[%s662_s1 + $0x18] sm:$0xff]   ;;  %v536_v8 = vld [vmem:[%s662_s1 + $0x10] sm:$0xff]   ;;  %vm406_vm1 = vcmask 1040384   ;;  %vm410_vm2 = vcmask 1044480  }
   0xd   : > { %363 = vmatpush1.bf16.msra.mxu0 %v531_v0  ;;  %s245_s8 = scalar_lea.vmem %s661_s0, %s521_s29  ;;  %v537_v9 = vld [vmem:[%s662_s1 + $0x8] sm:$0xff]   ;;  %v538_v10 = vld [vmem:[%s662_s1] sm:$0xff]   ;;  %v539_v11 = vld [vmem:[%s662_s1 + $0x58] sm:$0xff]   ;;  %s249_s16 = scalar_lea.vmem %s667_s6, %s521_s29 }
   0xe   : > { %364 = vmatprep.subr.bf16.mxu0 %v553_v1  ;;  %v503_v5 = vld.sshfl [vmem:[%s245_s8] sm:$0x33 pattern:$0x76325410]  ;;  %v540_v12 = vld [vmem:[%s662_s1 + $0x50] sm:$0xff]   ;;  %v541_v13 = vld [vmem:[%s662_s1 + $0x48] sm:$0xff]  }
   0xf   : > { %v284_v6 = vcombine.high %v503_v5, %v503_v5  ;;  %v542_v14 = vld [vmem:[%s662_s1 + $0x40] sm:$0xff]  }
  0x10   : > { %v402_v16 = vld [vmem:[%s663_s2] sm:$0x1] }
  0x11   : > { %365 = vmatpush1.bf16.msra.mxu0 %v532_v2  ;;  %516 = vmatprep.mubr.msk.bf16.mxu0 %vm358_vm0, %v284_v6  ;;  %v408_v18 = vld [vmem:[%s664_s3] sm:$0x1f] }
  0x12   : > { %366 = vmatprep.subr.bf16.mxu0 %v553_v1  ;;  %v517_v33 = vld [vmem:[%s665_s4] ss:$0 sm:$0xff] }
  0x13   : > { %v518_v35 = vld [vmem:[%s666_s5] ss:$0 sm:$0xff] }
  0x15   : > { %367 = vmatpush1.bf16.msra.mxu0 %v533_v3 }
  0x16   : > { %368 = vmatprep.subr.bf16.mxu0 %v553_v1 }
  0x19   : > { %369 = vmatpush1.bf16.msra.mxu0 %v534_v4 }
  0x1a   : > { %370 = vmatprep.subr.bf16.mxu0 %v553_v1 }
  0x1d   : > { %371 = vmatpush1.bf16.msra.mxu0 %v535_v7 }
  0x1e   : > { %372 = vmatprep.subr.bf16.mxu0 %v553_v1 }
  0x21   : > { %373 = vmatpush1.bf16.msra.mxu0 %v536_v8 }
  0x22   : > { %374 = vmatprep.subr.bf16.mxu0 %v553_v1 }
  0x25   : > { %375 = vmatpush1.bf16.msra.mxu0 %v537_v9 }
  0x26   : > { %376 = vmatprep.subr.bf16.mxu0 %v553_v1 }
  0x29   : > { %377 = vmatpush1.bf16.msra.mxu0 %v538_v10 }
  0x2a   : > { %386 = vmatprep.subr.bf16.mxu0 %v553_v1 }
  0x2d   : > { %387 = vmatpush2.bf16.msra.mxu0 %v539_v11 }
  0x2e   : > { %388 = vmatprep.subr.bf16.mxu0 %v553_v1 }
  0x31   : > { %389 = vmatpush2.bf16.msra.mxu0 %v540_v12 }
  0x32   : > { %390 = vmatprep.subr.bf16.mxu0 %v553_v1 }
  0x35   : > { %391 = vmatpush2.bf16.msra.mxu0 %v541_v13 }
  0x36   : > { %392 = vmatprep.subr.bf16.mxu0 %v553_v1 }
  0x39   : > { %393 = vmatpush2.bf16.msra.mxu0 %v542_v14 }
  0x3c   : > { %395 = vmatmul.mubr.bf16.vlgmr.msra.gmra.mxu0 %v503_v5 }
  0xfc   : > { %v396_v15 = vpop.f32.mrf.mxu0 }
  0xfd   : > { %v404_v17 = vrot.slane %v396_v15, 7 }
  0xfe   : > { %v398_v19 = vpop.f32.mrf.mxu0 }
  0xff   : > { %v407_v20 = vsel %vm406_vm1, %v402_v16, %v404_v17 }
 0x100   : > { %v399_v21 = vpop.f32.mrf.mxu0  ;;  %v409_v22 = vadd.f32 %v408_v18, %v407_v20 }
 0x102   : > { %v400_v23 = vpop.f32.mrf.mxu0  ;;  %v411_v24 = vsel %vm410_vm2, %v409_v22, 0.0 }
 0x103   : > { %414 = vadd.xlane.f32.xlu0 %v411_v24 }
 0x18c   : > { %v415_v25 = vpop.xlane.xlu0 %414 }
 0x18d   : > { %v417_v26 = vmul.f32 0.0078125, %v415_v25 }
 0x18f   : > { %v418_v27 = vsub.f32 %v411_v24, %v417_v26 }
 0x191   : > { %v419_v28 = vmul.f32 %v418_v27, %v418_v27 }
 0x193   : > { %420 = vadd.xlane.f32.xlu0 %v419_v28 }
 0x21c   : > { %v421_v29 = vpop.xlane.xlu0 %420 }
 0x21d   : > { %v422_v30 = vmul.f32 0.0078125, %v421_v29 }
 0x21f   : > { %v423_v31 = vadd.f32 1e-05, %v422_v30 }
 0x221   : > { %543 = vrsqrt.f32 %v423_v31 }
 0x22e   : > { %v544_v32 = vpop.eup %543 }
 0x22f   : > { %v425_v34 = vmul.f32 %v544_v32, %v418_v27 }
 0x231   : > { %v432_v36 = vmul.f32 %v517_v33, %v425_v34 }
 0x233   : > { %v439_v37 = vadd.f32 %v518_v35, %v432_v36 }
 0x235   : > { %v440_v38 = vpack.c.bf16 %v439_v37, %v439_v37 }
 0x237   : > { %441 = vst [vmem:[%s249_s16] sm:$0xf] %v440_v38 }
 0x238 PF: > { %s16_s21 = sadd.s32 1, %s551_s21  }
 0x239   : > { %p13_p4 = scmp.ge.s32.totalorder %s16_s21, 4  }
 0x23b   :  { %15 = sbr.rel (!%p13_p4) target bundleno = 1 (0x1), region = 74 }

// kernel: vit_forward.7
= control target key start
LH: loop header
LB: loop body
LE: loop exit
PB: predicated region body
PF: predicated region fallthrough
CT: control target
= control target key end

     0   :  { %s1500_s24 = smov 0   ;;  %s1732_s0 = inlined_call_operand.vmem [shape: bf16[2,8,128], index: 0, kind: input, shape index: {}]   ;;  %s1733_s1 = inlined_call_operand.vmem [shape: f32[1,128], index: 1, kind: input, shape index: {}]   ;;  %s1734_s2 = inlined_call_operand.vmem [shape: f32[1,128], index: 2, kind: input, shape index: {}]   ;;  %s1735_s3 = inlined_call_operand.vmem [shape: bf16[128,384], index: 3, kind: input, shape index: {}]   ;;  %s1736_s4 = inlined_call_operand.vmem [shape: f32[1,384], index: 4, kind: input, shape index: {}]   ;;  %s1737_s5 = inlined_call_operand.vmem [shape: bf16[128,128], index: 5, kind: input, shape index: {}]   ;;  %s1738_s6 = inlined_call_operand.vmem [shape: f32[1,128], index: 6, kind: input, shape index: {}]   ;;  %s1739_s7 = inlined_call_operand.vmem [shape: bf16[2,8,128], index: 7, kind: output, shape index: {}]  }
   0x1 LB: > { %s1198_s25 = sadd.s32 4294967295, %s1451_s24   ;;  %p1202_p0 = scmp.ge.s32.totalorder %s1451_s24, 1  ;;  %s1451_s24 = sphi %s1500_s24, %s17_s24  }
   0x2   : > { %p236_p1 = scmp.lt.s32.totalorder %s1451_s24, 3 }
   0x4   : > { %p237_p2 = pnand %p1202_p0, %p236_p1 }
   0x5   : > { %p266_p3 = scmp.lt.s32.totalorder (!%p237_p2), %s1198_s25, 1  ;;  %s1456_s21 = smov (!%p237_p2), 96  }
   0x6   : > { %240 = sbr.rel (%p237_p2) target bundleno = 1777 (0x6f1), region = 48  ;;  %s1457_s22 = smov (!%p237_p2), 32  }
   0x7   : > { %s1459_s23 = smov (!%p237_p2), 64  }
   0xb   : > { %s1741_s25 = smov (!%p266_p3, %s1198_s25), 1  ;;  %v1387_v2 = vld [vmem:[%s1735_s3 + $0xac] ss:$12 sps:$4 sm:$0xff]   ;;  %v1389_v3 = vld [vmem:[%s1735_s3 + $0xa8] ss:$12 sps:$4 sm:$0xff]   ;;  %v1453_v4 = vmov 0.0   ;;  %v340_v42 = vlaneseq }
   0xc   : > { %s1203_s26 = sshll.u32 %s1741_s25, 2  ;;  %1284 = vmatprep.subr.bf16.mxu1 %v1453_v4  ;;  %v1390_v5 = vld [vmem:[%s1735_s3 + $0xb0] ss:$12 sps:$4 sm:$0xff]   ;;  %v1391_v6 = vld [vmem:[%s1735_s3 + $0x94] ss:$12 sps:$4 sm:$0xff]   ;;  %483 = vmatprep.subr.bf16.mxu0 %v1387_v2  ;;  %v1454_v23 = vmov 0  }
   0xd   : > { %s269_s29 = scalar_lea.vmem %s1732_s0, %s1203_s26  ;;  %484 = vmatpush1.bf16.msra.mxu0 %v1389_v3  ;;  %1285 = vmatpush3.bf16.msra.mxu1 %v1390_v5  ;;  %v1393_v7 = vld [vmem:[%s1735_s3 + $0x90] ss:$12 sps:$4 sm:$0xff]   ;;  %v1394_v8 = vld [vmem:[%s1735_s3 + $0x98] ss:$12 sps:$4 sm:$0xff]   ;;  %v1398_v15 = vld [vmem:[%s1735_s3 + $0x80] ss:$12 sps:$4 sm:$0xff]   ;;  %s273_s27 = scalar_lea.vmem %s1739_s7, %s1203_s26 }
   0xe   : > { %v275_v0 = vld [vmem:[%s269_s29] sm:$0xf]  ;;  %485 = vmatprep.subr.bf16.mxu0 %v1391_v6  ;;  %1286 = vmatprep.subr.bf16.mxu1 %v1453_v4  ;;  %v1395_v13 = vld [vmem:[%s1735_s3 + $0x7c] ss:$12 sps:$4 sm:$0xff]   ;;  %v1397_v14 = vld [vmem:[%s1735_s3 + $0x78] ss:$12 sps:$4 sm:$0xff]  }
   0xf   : > { %v1516_v1 = vunpack.c.l.bf16 %v275_v0  ;;  %v1399_v16 = vld [vmem:[%s1735_s3 + $0x64] ss:$12 sps:$4 sm:$0xff]   ;;  %v1401_v17 = vld [vmem:[%s1735_s3 + $0x60] ss:$12 sps:$4 sm:$0xff]   ;;  %v1402_v18 = vld [vmem:[%s1735_s3 + $0x68] ss:$12 sps:$4 sm:$0xff]   ;;  %515 = vmatprep.mubr.bf16.mxu0 %v1454_v23 }
  0x10   : > { %v1403_v19 = vld [vmem:[%s1735_s3 + $0x4c] ss:$12 sps:$4 sm:$0xff]   ;;  %v1405_v20 = vld [vmem:[%s1735_s3 + $0x48] ss:$12 sps:$4 sm:$0xff]   ;;  %v1406_v21 = vld [vmem:[%s1735_s3 + $0x50] ss:$12 sps:$4 sm:$0xff]  }
  0x11   : > { %279 = vadd.xlane.f32.xlu0 %v1516_v1  ;;  %486 = vmatpush1.bf16.msra.mxu0 %v1393_v7  ;;  %v1407_v22 = vld [vmem:[%s1735_s3 + $0x34] ss:$12 sps:$4 sm:$0xff]   ;;  %vm1455_vm0 = vmmov 0   ;;  %v1409_v24 = vld [vmem:[%s1735_s3 + $0x30] ss:$12 sps:$4 sm:$0xff]   ;;  %v341_v43 = vshrl.u32 %v340_v42, 7 }
  0x12   : > { %1287 = vmatpush3.bf16.msra.mxu1 %v1394_v8  ;;  %487 = vmatprep.subr.bf16.mxu0 %v1395_v13  ;;  %v1410_v25 = vld [vmem:[%s1735_s3 + $0x38] ss:$12 sps:$4 sm:$0xff]   ;;  %v1411_v26 = vld [vmem:[%s1735_s3 + $0x1c] ss:$12 sps:$4 sm:$0xff]   ;;  %v1414_v28 = vld [vmem:[%s1735_s3 + $0x20] ss:$12 sps:$4 sm:$0xff]  }
  0x13   : > { %1288 = vmatprep.subr.bf16.mxu1 %v1453_v4  ;;  %1300 = vmatprep.mubr.msk.bf16.mxu1 %vm1455_vm0, %v1453_v4  ;;  %v1413_v27 = vld [vmem:[%s1735_s3 + $0x18] ss:$12 sps:$4 sm:$0xff]   ;;  %v1417_v30 = vld [vmem:[%s1735_s3] ss:$12 sps:$4 sm:$0xff]   ;;  %v1418_v31 = vld [vmem:[%s1735_s3 + $0x8] ss:$12 sps:$4 sm:$0xff]  }
  0x14   : > { %v1415_v29 = vld [vmem:[%s1735_s3 + $0x4] ss:$12 sps:$4 sm:$0xff]   ;;  %v1205_v36 = vld [vmem:[%s1733_s1] ss:$0 sm:$0xff]  ;;  %v342_v44 = vsub.s32 0, %v341_v43  ;;  %v346_v46 = vsub.s32 1, %v341_v43 }
  0x15   : > { %488 = vmatpush1.bf16.msra.mxu0 %v1397_v14  ;;  %v1206_v38 = vld [vmem:[%s1734_s2] ss:$0 sm:$0xff]  ;;  %v350_v48 = vsub.s32 2, %v341_v43  ;;  %vm572_vm1 = vcmask 261120   ;;  %vm633_vm2 = vcmask 1043456   ;;  %v565_v6 = vand.u32 127, %v340_v42 }
  0x16   : > { %1289 = vmatpush3.bf16.msra.mxu1 %v1398_v15  ;;  %489 = vmatprep.subr.bf16.mxu0 %v1399_v16  ;;  %v338_v45 = vld [vmem:[%s1736_s4] sm:$0x7]  ;;  %v1458_v7 = vmov -1e+30   ;;  %vm619_vm4 = vcmask 64512   ;;  %vm1025_vm5 = vcmask 523264  }
  0x17   : > { %1290 = vmatprep.subr.bf16.mxu1 %v1453_v4  ;;  %v343_v47 = vrot.slane %v338_v45, %v342_v44  ;;  %v347_v49 = vrot.slane %v338_v45, %v346_v46  ;;  %v351_v56 = vrot.slane %v338_v45, %v350_v48  ;;  %vm566_vm3 = vcmp.lt.s32.totalorder %v565_v6, 5 }
  0x18   : > { %v567_v8 = vsel %vm566_vm3, 0.0, %v1458_v7  ;;  %vm1027_vm6 = vcmask 785408  }
  0x19   : > { %490 = vmatpush1.bf16.msra.mxu0 %v1401_v17 }
  0x1a   : > { %1291 = vmatpush3.bf16.msra.mxu1 %v1402_v18  ;;  %491 = vmatprep.subr.bf16.mxu0 %v1403_v19 }
  0x1b   : > { %1292 = vmatprep.subr.bf16.mxu1 %v1453_v4 }
  0x1d   : > { %492 = vmatpush1.bf16.msra.mxu0 %v1405_v20 }
  0x1e   : > { %1293 = vmatpush3.bf16.msra.mxu1 %v1406_v21  ;;  %493 = vmatprep.subr.bf16.mxu0 %v1407_v22 }
  0x1f   : > { %1294 = vmatprep.subr.bf16.mxu1 %v1453_v4 }
  0x21   : > { %494 = vmatpush1.bf16.msra.mxu0 %v1409_v24 }
  0x22   : > { %1295 = vmatpush3.bf16.msra.mxu1 %v1410_v25  ;;  %495 = vmatprep.subr.bf16.mxu0 %v1411_v26 }
  0x23   : > { %1296 = vmatprep.subr.bf16.mxu1 %v1453_v4 }
  0x25   : > { %496 = vmatpush1.bf16.msra.mxu0 %v1413_v27 }
  0x26   : > { %1297 = vmatpush3.bf16.msra.mxu1 %v1414_v28  ;;  %497 = vmatprep.subr.bf16.mxu0 %v1415_v29 }
  0x27   : > { %1298 = vmatprep.subr.bf16.mxu1 %v1453_v4 }
  0x29   : > { %498 = vmatpush1.bf16.msra.mxu0 %v1417_v30 }
  0x2a   : > { %1299 = vmatpush3.bf16.msra.mxu1 %v1418_v31  ;;  %1328 = vmatprep.subr.bf16.mxu0 %v1453_v4 }
  0x2b   : > { %1304 = vmatprep.subr.bf16.mxu1 %v1453_v4 }
  0x9a   : > { %v280_v9 = vpop.xlane.xlu0 %279 }
  0x9b   : > { %v282_v10 = vmul.f32 0.0078125, %v280_v9 }
  0x9d   : > { %v283_v11 = vsub.f32 %v1516_v1, %v282_v10 }
  0x9f   : > { %v284_v12 = vmul.f32 %v283_v11, %v283_v11 }
  0xa1   : > { %285 = vadd.xlane.f32.xlu0 %v284_v12 }
 0x12a   : > { %v286_v32 = vpop.xlane.xlu0 %285 }
 0x12b   : > { %v287_v33 = vmul.f32 0.0078125, %v286_v32 }
 0x12d   : > { %v288_v34 = vadd.f32 1e-05, %v287_v33 }
 0x12f   : > { %1427 = vrsqrt.f32 %v288_v34 }
 0x13c   : > { %v1428_v35 = vpop.eup %1427 }
 0x13d   : > { %v290_v37 = vmul.f32 %v1428_v35, %v283_v11 }
 0x13f   : > { %v297_v39 = vmul.f32 %v1205_v36, %v290_v37 }
 0x141   : > { %v304_v40 = vadd.f32 %v1206_v38, %v297_v39 }
 0x143   : > { %v305_v41 = vpack.c.bf16 %v304_v40, %v304_v40 }
 0x145   : > { %516 = vmatmul.mubr.bf16.vlgmr.msra.gmra.mxu0 %v305_v41  ;;  %1301 = vmatmul.mubr.bf16.vlgmr.msra.gmra.mxu1 %v305_v41 }
 0x146   : > { %1306 = vmatprep.mubr.msk.bf16.mxu1 %vm1455_vm0, %v1453_v4  ;;  %1330 = vmatprep.mubr.msk.bf16.mxu0 %vm1455_vm0, %v1453_v4 }
 0x205   : > { %v517_v50 = vpop.f32.mrf.mxu0  ;;  %v558_v51 = vpop.f32.mrf.mxu1 }
 0x206   : > { %v518_v52 = vadd.f32 %v517_v50, %v343_v47  ;;  %v559_v0 = vadd.f32 %v558_v51, %v351_v56 }
 0x207   : > { %v519_v53 = vpop.f32.mrf.mxu0  ;;  %v1302_v54 = vpop.f32.mrf.mxu1 }
 0x208   : > { %v568_v55 = vmul.f32 0.17677669, %v518_v52  ;;  %v520_v57 = vadd.f32 %v519_v53, %v347_v49  ;;  %v1620_v3 = vpack.c.bf16 %v559_v0, %v559_v0 }
 0x209   : > { %v521_v58 = vpop.f32.mrf.mxu0  ;;  %v561_v59 = vpop.f32.mrf.mxu1 }
 0x20a   : > { %v569_v60 = vpack.c.bf16 %v568_v55, %v568_v55  ;;  %v570_v61 = vpack.c.bf16 %v520_v57, %v520_v57  ;;  %v635_v5 = vsel %vm633_vm2, %v1620_v3, 0 }
 0x20b   : > { %v522_v62 = vpop.f32.mrf.mxu0  ;;  %v1303_v63 = vpop.f32.mrf.mxu1 }
 0x20c   : > { %680 = vrot.lane.b32.xlu0 %v569_v60, %s1456_s21  ;;  %v577_v2 = vsel %vm572_vm1, %v570_v61, 0 }
 0x20d   : > { %1305 = vmatpush3.bf16.xpose.msra.mxu1 %v577_v2 }
 0x20e   : > { %1310 = vmatprep.subr.bf16.mxu1 %v1453_v4 }
 0x210   : > { %902 = vrot.lane.b32.xlu0 %v569_v60, %s1457_s22 }
 0x214   : > { %1307 = vmatmul.mubr.msk.bf16.vlgmr.msra.gmra.mxu1 %vm572_vm1, %v569_v60 }
 0x215   : > { %1311 = vmatpush3.bf16.msra.mxu1 %v635_v5  ;;  %1312 = vmatprep.mubr.msk.bf16.mxu1 %vm1455_vm0, %v1453_v4 }
 0x216   : > { %1316 = vmatprep.subr.bf16.mxu1 %v1453_v4 }
 0x27e   : > { %v681_v25 = vpop.permute.xlu0 %680 }
 0x282   : > { %v903_v28 = vpop.permute.xlu0 %902 }
 0x2d4   : > { %v613_v9 = vpop.f32.mrf.mxu1 }
 0x2d5   : > { %v614_v10 = vadd.f32 %v613_v9, %v567_v8 }
 0x2d6   : > { %v1308_v11 = vpop.f32.mrf.mxu1 }
 0x2d7   : > { %v620_v12 = vsel %vm619_vm4, %v614_v10, -inf }
 0x2d8   : > { %621 = vmax.xlane.f32.xlu1 %v620_v12  ;;  %v616_v13 = vpop.f32.mrf.mxu1 }
 0x2da   : > { %v1309_v14 = vpop.f32.mrf.mxu1 }
 0x2db   : > { %v1419_v14 = vld [vmem:[%s1737_s5 + $0x38] sm:$0xff]  }
 0x2e9   : > { %683 = vrot.lane.b32.xlu1 %v570_v61, %s1456_s21 }
 0x2ed   : > { %794 = vrot.lane.b32.xlu1 %v570_v61, %s1459_s23 }
 0x2f1   : > { %792 = vrot.lane.b32.xlu1 %v569_v60, %s1459_s23 }
 0x2f5   : > { %904 = vrot.lane.b32.xlu1 %v570_v61, %s1457_s22 }
 0x361   : > { %v622_v15 = vpop.xlane.xlu1 %621 }
 0x362   : > { %v623_v16 = vsub.f32 %v614_v10, %v622_v15  ;;  %v1420_v15 = vld [vmem:[%s1737_s5 + $0x30] sm:$0xff]  }
 0x364   : > { %v624_v17 = vmul.f32 1.442695, %v623_v16  ;;  %v1421_v16 = vld [vmem:[%s1737_s5 + $0x28] sm:$0xff]  }
 0x365   : > { %v684_v18 = vpop.permute.xlu1 %683 }
 0x366   : > { %1429 = vpow2.f32 %v624_v17  ;;  %v689_v27 = vsel %vm572_vm1, %v684_v18, 0  ;;  %v1422_v18 = vld [vmem:[%s1737_s5 + $0x20] sm:$0xff]  }
 0x369   : > { %v795_v19 = vpop.permute.xlu1 %794 }
 0x36a   : > { %v800_v20 = vsel %vm572_vm1, %v795_v19, 0  ;;  %v1423_v19 = vld [vmem:[%s1737_s5 + $0x18] sm:$0xff]  }
 0x36b   : > { %1329 = vmatpush3.bf16.xpose.msra.mxu0 %v800_v20 }
 0x36c   : > { %1340 = vmatprep.subr.bf16.mxu0 %v1453_v4 }
 0x36d   : > { %v793_v21 = vpop.permute.xlu1 %792 }
 0x371   : > { %v905_v22 = vpop.permute.xlu1 %904 }
 0x372   : > { %v910_v23 = vsel %vm572_vm1, %v905_v22, 0  ;;  %1331 = vmatmul.mubr.msk.bf16.vlgmr.msra.gmra.mxu0 %vm572_vm1, %v793_v21  ;;  %v1424_v21 = vld [vmem:[%s1737_s5 + $0x10] sm:$0xff]   ;;  %v1425_v22 = vld [vmem:[%s1737_s5 + $0x8] sm:$0xff]  }
 0x373   : > { %v1638_v24 = vpop.eup %1429  ;;  %1341 = vmatpush3.bf16.xpose.msra.mxu0 %v910_v23  ;;  %1342 = vmatprep.mubr.msk.bf16.mxu0 %vm1455_vm0, %v1453_v4 }
 0x374   : > { %v629_v26 = vpack.c.bf16 %v1638_v24, %v1638_v24  ;;  %1352 = vmatprep.subr.bf16.mxu0 %v1453_v4  ;;  %v626_v6 = vsel %vm619_vm4, %v1638_v24, 0.0 }
 0x376   : > { %1313 = vmatmul.mubr.msk.bf16.vlgmr.msra.gmra.mxu1 %vm619_vm4, %v629_v26 }
 0x377   : > { %1317 = vmatpush3.bf16.xpose.msra.mxu1 %v689_v27  ;;  %1318 = vmatprep.mubr.msk.bf16.mxu1 %vm1455_vm0, %v1453_v4 }
 0x378   : > { %1322 = vmatprep.subr.bf16.mxu1 %v1453_v4 }
 0x37a   : > { %1343 = vmatmul.mubr.msk.bf16.vlgmr.msra.gmra.mxu0 %vm572_vm1, %v903_v28 }
 0x37b   : > { %1368 = vmatprep.mubr.msk.bf16.mxu0 %vm1455_vm0, %v1453_v4  ;;  %1353 = vmatpush3.bf16.msra.mxu0 %v1419_v14 }
 0x37c   : > { %1354 = vmatprep.subr.bf16.mxu0 %v1453_v4 }
 0x37e   : > { %1319 = vmatmul.mubr.msk.bf16.vlgmr.msra.gmra.mxu1 %vm572_vm1, %v681_v25 }
 0x37f   : > { %1324 = vmatprep.mubr.msk.bf16.mxu1 %vm1455_vm0, %v1453_v4  ;;  %1355 = vmatpush3.bf16.msra.mxu0 %v1420_v15 }
 0x380   : > { %1356 = vmatprep.subr.bf16.mxu0 %v1453_v4 }
 0x383   : > { %1357 = vmatpush3.bf16.msra.mxu0 %v1421_v16 }
 0x384   : > { %1358 = vmatprep.subr.bf16.mxu0 %v1453_v4 }
 0x387   : > { %1359 = vmatpush3.bf16.msra.mxu0 %v1422_v18 }
 0x388   : > { %1360 = vmatprep.subr.bf16.mxu0 %v1453_v4 }
 0x38b   : > { %1361 = vmatpush3.bf16.msra.mxu0 %v1423_v19 }
 0x38c   : > { %1362 = vmatprep.subr.bf16.mxu0 %v1453_v4 }
 0x38f   : > { %1363 = vmatpush3.bf16.msra.mxu0 %v1424_v21 }
 0x390   : > { %1364 = vmatprep.subr.bf16.mxu0 %v1453_v4 }
 0x393   : > { %1365 = vmatpush3.bf16.msra.mxu0 %v1425_v22 }
 0x394   : > { %1366 = vmatprep.subr.bf16.mxu0 %v1453_v4 }
 0x432   : > { %v836_v29 = vpop.f32.mrf.mxu0 }
 0x433   : > { %v837_v30 = vadd.f32 %v836_v29, %v567_v8  ;;  %v1426_v29 = vld [vmem:[%s1737_s5] sm:$0xff]  }
 0x434   : > { %v1332_v31 = vpop.f32.mrf.mxu0  ;;  %1367 = vmatpush3.bf16.msra.mxu0 %v1426_v29 }
 0x435   : > { %v842_v32 = vsel %vm619_vm4, %v837_v30, -inf }
 0x436   : > { %843 = vmax.xlane.f32.xlu0 %v842_v32  ;;  %v1657_v33 = vpop.f32.mrf.mxu1  ;;  %v839_v34 = vpop.f32.mrf.mxu0 }
 0x438   : > { %v1314_v35 = vpop.f32.mrf.mxu1  ;;  %v1333_v36 = vpop.f32.mrf.mxu0 }
 0x43a   : > { %v674_v37 = vpop.f32.mrf.mxu1  ;;  %v946_v38 = vpop.f32.mrf.mxu0 }
 0x43b   : > { %v947_v39 = vadd.f32 %v946_v38, %v567_v8 }
 0x43c   : > { %v1315_v40 = vpop.f32.mrf.mxu1  ;;  %v1344_v41 = vpop.f32.mrf.mxu0 }
 0x43d   : > { %v952_v42 = vsel %vm619_vm4, %v947_v39, -inf }
 0x43e   : > { %953 = vmax.xlane.f32.xlu0 %v952_v42  ;;  %v725_v43 = vpop.f32.mrf.mxu1  ;;  %v949_v44 = vpop.f32.mrf.mxu0 }
 0x43f   : > { %v726_v45 = vadd.f32 %v725_v43, %v567_v8 }
 0x440   : > { %v1320_v46 = vpop.f32.mrf.mxu1  ;;  %v1345_v47 = vpop.f32.mrf.mxu0 }
 0x441   : > { %v731_v48 = vsel %vm619_vm4, %v726_v45, -inf }
 0x442   : > { %732 = vmax.xlane.f32.xlu1 %v731_v48  ;;  %v728_v49 = vpop.f32.mrf.mxu1 }
 0x444   : > { %v1321_v50 = vpop.f32.mrf.mxu1 }
 0x453   : > { %852 = vrot.lane.b32.xlu1 %v1620_v3, %s1459_s23 }
 0x454   : > { %742 = vrot.lane.b32.xlu0 %v1620_v3, %s1456_s21 }
 0x457   : > { %962 = vrot.lane.b32.xlu1 %v1620_v3, %s1457_s22 }
 0x4bf   : > { %v844_v51 = vpop.xlane.xlu0 %843 }
 0x4c0   : > { %v845_v52 = vsub.f32 %v837_v30, %v844_v51 }
 0x4c2   : > { %v846_v53 = vmul.f32 1.442695, %v845_v52 }
 0x4c4   : > { %1431 = vpow2.f32 %v846_v53 }
 0x4c7   : > { %v954_v54 = vpop.xlane.xlu0 %953 }
 0x4c8   : > { %v955_v55 = vsub.f32 %v947_v39, %v954_v54  ;;  %v1247_v54 = vld [vmem:[%s1738_s6] ss:$0 sm:$0xff] }
 0x4ca   : > { %v956_v56 = vmul.f32 1.442695, %v955_v55 }
 0x4cb   : > { %v743_v57 = vpop.permute.xlu0 %742  ;;  %v733_v58 = vpop.xlane.xlu1 %732 }
 0x4cc   : > { %1433 = vpow2.f32 %v956_v56  ;;  %v748_v59 = vsel %vm633_vm2, %v743_v57, 0  ;;  %v734_v60 = vsub.f32 %v726_v45, %v733_v58 }
 0x4cd   : > { %1323 = vmatpush3.bf16.msra.mxu1 %v748_v59 }
 0x4ce   : > { %v735_v61 = vmul.f32 1.442695, %v734_v60  ;;  %1334 = vmatprep.subr.bf16.mxu1 %v1453_v4 }
 0x4cf   : > { %v853_v5 = vpop.permute.xlu1 %852 }
 0x4d0   : > { %1435 = vpow2.f32 %v735_v61  ;;  %v858_v9 = vsel %vm633_vm2, %v853_v5, 0 }
 0x4d1   : > { %v1432_v62 = vpop.eup %1431 }
 0x4d2   : > { %v848_v63 = vsel %vm619_vm4, %v1432_v62, 0.0  ;;  %v851_v11 = vpack.c.bf16 %v1432_v62, %v1432_v62 }
 0x4d3   : > { %849 = vadd.xlane.f32.xlu0 %v848_v63  ;;  %v963_v10 = vpop.permute.xlu1 %962 }
 0x4d4   : > { %v968_v12 = vsel %vm633_vm2, %v963_v10, 0 }
 0x4d9   : > { %v1434_v0 = vpop.eup %1433 }
 0x4da   : > { %v958_v2 = vsel %vm619_vm4, %v1434_v0, 0.0  ;;  %v961_v13 = vpack.c.bf16 %v1434_v0, %v1434_v0 }
 0x4db   : > { %959 = vadd.xlane.f32.xlu0 %v958_v2 }
 0x4dd   : > { %v1436_v3 = vpop.eup %1435 }
 0x4de   : > { %v737_v7 = vsel %vm619_vm4, %v1436_v3, 0.0  ;;  %v740_v8 = vpack.c.bf16 %v1436_v3, %v1436_v3 }
 0x4df   : > { %627 = vadd.xlane.f32.xlu0 %v626_v6  ;;  %738 = vadd.xlane.f32.xlu1 %v737_v7 }
 0x4e0   : > { %1325 = vmatmul.mubr.msk.bf16.vlgmr.msra.gmra.mxu1 %vm619_vm4, %v740_v8 }
 0x4e1   : > { %1335 = vmatpush3.bf16.msra.mxu1 %v858_v9  ;;  %1336 = vmatprep.mubr.msk.bf16.mxu1 %vm1455_vm0, %v1453_v4 }
 0x4e2   : > { %1346 = vmatprep.subr.bf16.mxu1 %v1453_v4 }
 0x4e8   : > { %1337 = vmatmul.mubr.msk.bf16.vlgmr.msra.gmra.mxu1 %vm619_vm4, %v851_v11 }
 0x4e9   : > { %1347 = vmatpush3.bf16.msra.mxu1 %v968_v12  ;;  %1348 = vmatprep.mubr.msk.bf16.mxu1 %vm1455_vm0, %v1453_v4 }
 0x4f0   : > { %1349 = vmatmul.mubr.msk.bf16.vlgmr.msra.gmra.mxu1 %vm619_vm4, %v961_v13 }
 0x55c   : > { %v850_v20 = vpop.xlane.xlu0 %849 }
 0x564   : > { %v960_v24 = vpop.xlane.xlu0 %959 }
 0x568   : > { %v739_v17 = vpop.xlane.xlu1 %738  ;;  %v628_v43 = vpop.xlane.xlu0 %627 }
 0x569   : > { %1437 = vrcp.f32 %v739_v17 }
 0x56a   : > { %1439 = vrcp.f32 %v850_v20 }
 0x56b   : > { %1441 = vrcp.f32 %v960_v24 }
 0x56c   : > { %1443 = vrcp.f32 %v628_v43 }
 0x576   : > { %v1438_v23 = vpop.eup %1437 }
 0x577   : > { %v1440_v31 = vpop.eup %1439 }
 0x578   : > { %v1442_v38 = vpop.eup %1441 }
 0x579   : > { %v1444_v44 = vpop.eup %1443 }
 0x57a   : > { %v678_v46 = vmul.f32 %v1444_v44, %v1657_v33 }
 0x5a0   : > { %v784_v25 = vpop.f32.mrf.mxu1 }
 0x5a1   : > { %v791_v26 = vmul.f32 %v1438_v23, %v784_v25 }
 0x5a2   : > { %v1326_v27 = vpop.f32.mrf.mxu1 }
 0x5a3   : > { %1013 = vrot.lane.b32.xlu1 %v791_v26, %s1457_s22 }
 0x5a4   : > { %v787_v28 = vpop.f32.mrf.mxu1 }
 0x5a6   : > { %v1327_v30 = vpop.f32.mrf.mxu1 }
 0x5a8   : > { %v894_v32 = vpop.f32.mrf.mxu1 }
 0x5a9   : > { %v901_v34 = vmul.f32 %v1440_v31, %v894_v32 }
 0x5aa   : > { %v1338_v35 = vpop.f32.mrf.mxu1 }
 0x5ab   : > { %1017 = vrot.lane.b32.xlu0 %v901_v34, %s1459_s23 }
 0x5ac   : > { %v897_v36 = vpop.f32.mrf.mxu1 }
 0x5ae   : > { %v1339_v37 = vpop.f32.mrf.mxu1 }
 0x5b0   : > { %v1004_v39 = vpop.f32.mrf.mxu1 }
 0x5b1   : > { %v1011_v40 = vmul.f32 %v1442_v38, %v1004_v39 }
 0x5b2   : > { %v1350_v41 = vpop.f32.mrf.mxu1 }
 0x5b3   : > { %1021 = vrot.lane.b32.xlu1 %v1011_v40, %s1456_s21 }
 0x5b4   : > { %v1007_v4 = vpop.f32.mrf.mxu1 }
 0x5b6   : > { %v1351_v42 = vpop.f32.mrf.mxu1 }
 0x615   : > { %v1014_v45 = vpop.permute.xlu1 %1013 }
 0x616   : > { %v1024_v48 = vsel %vm572_vm1, %v678_v46, %v1014_v45 }
 0x61d   : > { %v1018_v47 = vpop.permute.xlu0 %1017 }
 0x61e   : > { %v1026_v49 = vsel %vm1025_vm5, %v1024_v48, %v1018_v47 }
 0x625   : > { %v1022_v50 = vpop.permute.xlu1 %1021 }
 0x626   : > { %v1028_v51 = vsel %vm1027_vm6, %v1026_v49, %v1022_v50 }
 0x627   : > { %v1029_v52 = vpack.c.bf16 %v1028_v51, %v1028_v51 }
 0x629   : > { %1369 = vmatmul.mubr.bf16.vlgmr.msra.gmra.mxu0 %v1029_v52 }
 0x6e9   : > { %v1128_v53 = vpop.f32.mrf.mxu0 }
 0x6ea   : > { %v1134_v55 = vadd.f32 %v1128_v53, %v1516_v1 }
 0x6eb   : > { %v1370_v56 = vpop.f32.mrf.mxu0 }
 0x6ec   : > { %v1142_v57 = vadd.f32 %v1247_v54, %v1134_v55 }
 0x6ed   : > { %v1131_v33 = vpop.f32.mrf.mxu0 }
 0x6ee   : > { %v1143_v58 = vpack.c.bf16 %v1142_v57, %v1142_v57 }
 0x6ef   : > { %v1371_v59 = vpop.f32.mrf.mxu0 }
 0x6f0   : > { %1144 = vst [vmem:[%s273_s27] sm:$0xf] %v1143_v58 }
 0x6f1 PF: > { %s17_s24 = sadd.s32 1, %s1451_s24  }
 0x6f2   : > { %p14_p4 = scmp.ge.s32.totalorder %s17_s24, 4  }
 0x6f4   :  { %16 = sbr.rel (!%p14_p4) target bundleno = 1 (0x1), region = 78 }

// kernel: vit_forward.8
= control target key start
LH: loop header
LB: loop body
LE: loop exit
PB: predicated region body
PF: predicated region fallthrough
CT: control target
= control target key end

     0   :  { %v657_v22 = vmov 0   ;;  %v91_v61 = vlaneseq  ;;  %s854_s0 = inlined_call_operand.vmem [shape: bf16[16,128], index: 0, kind: input, shape index: {}]   ;;  %s855_s3 = inlined_call_operand.vmem [shape: bf16[128,256], index: 3, kind: input, shape index: {}]   ;;  %s856_s1 = inlined_call_operand.vmem [shape: f32[1,128], index: 1, kind: input, shape index: {}]   ;;  %s857_s2 = inlined_call_operand.vmem [shape: f32[1,128], index: 2, kind: input, shape index: {}]   ;;  %s858_s5 = inlined_call_operand.vmem [shape: bf16[256,128], index: 5, kind: input, shape index: {}]   ;;  %s859_s4 = inlined_call_operand.vmem [shape: f32[1,256], index: 4, kind: input, shape index: {}]   ;;  %s860_s6 = inlined_call_operand.vmem [shape: f32[1,128], index: 6, kind: input, shape index: {}]   ;;  %s861_s7 = inlined_call_operand.vmem [shape: bf16[16,128], index: 7, kind: output, shape index: {}]  }
   0x1   :  { %v566_v0 = vld [vmem:[%s854_s0] sm:$0xff]   ;;  %v597_v3 = vld [vmem:[%s855_s3 + $0x74] ss:$8 sps:$4 sm:$0xff]   ;;  %v599_v4 = vld [vmem:[%s855_s3 + $0x70] ss:$8 sps:$4 sm:$0xff]   ;;  %213 = vmatprep.mubr.bf16.mxu0 %v657_v22 }
   0x2   :  { %v701_v1 = vunpack.c.l.bf16 %v566_v0  ;;  %v704_v2 = vunpack.c.h.bf16 %v566_v0  ;;  %181 = vmatprep.subr.bf16.mxu0 %v597_v3  ;;  %v600_v13 = vld [vmem:[%s855_s3 + $0x64] ss:$8 sps:$4 sm:$0xff]   ;;  %v602_v14 = vld [vmem:[%s855_s3 + $0x60] ss:$8 sps:$4 sm:$0xff]   ;;  %v603_v15 = vld [vmem:[%s855_s3 + $0x54] ss:$8 sps:$4 sm:$0xff]  }
   0x3   :  { %182 = vmatpush1.bf16.msra.mxu0 %v599_v4  ;;  %v605_v16 = vld [vmem:[%s855_s3 + $0x50] ss:$8 sps:$4 sm:$0xff]   ;;  %v606_v17 = vld [vmem:[%s855_s3 + $0x44] ss:$8 sps:$4 sm:$0xff]   ;;  %v608_v18 = vld [vmem:[%s855_s3 + $0x40] ss:$8 sps:$4 sm:$0xff]  }
   0x4   :  { %33 = vadd.xlane.f32.xlu0 %v701_v1  ;;  %183 = vmatprep.subr.bf16.mxu0 %v600_v13  ;;  %v609_v19 = vld [vmem:[%s855_s3 + $0x34] ss:$8 sps:$4 sm:$0xff]   ;;  %v611_v20 = vld [vmem:[%s855_s3 + $0x30] ss:$8 sps:$4 sm:$0xff]   ;;  %v612_v21 = vld [vmem:[%s855_s3 + $0x24] ss:$8 sps:$4 sm:$0xff]  }
   0x5   :  { %v614_v23 = vld [vmem:[%s855_s3 + $0x20] ss:$8 sps:$4 sm:$0xff]   ;;  %v615_v24 = vld [vmem:[%s855_s3 + $0x14] ss:$8 sps:$4 sm:$0xff]   ;;  %v617_v25 = vld [vmem:[%s855_s3 + $0x10] ss:$8 sps:$4 sm:$0xff]  }
   0x6   :  { %v618_v26 = vld [vmem:[%s855_s3 + $0x4] ss:$8 sps:$4 sm:$0xff]   ;;  %v620_v27 = vld [vmem:[%s855_s3] ss:$8 sps:$4 sm:$0xff]   ;;  %v621_v45 = vld [vmem:[%s858_s5 + $0x78] sm:$0xff]   ;;  %v92_v62 = vshrl.u32 %v91_v61, 7 }
   0x7   :  { %184 = vmatpush1.bf16.msra.mxu0 %v602_v14  ;;  %v526_v36 = vld [vmem:[%s856_s1] ss:$0 sm:$0xff]  ;;  %v622_v46 = vld [vmem:[%s858_s5 + $0x38] sm:$0xff]   ;;  %574 = vmatprep.subr.bf16.mxu1 %v621_v45  ;;  %v623_v47 = vld [vmem:[%s858_s5 + $0x70] sm:$0xff]  }
   0x8   :  { %35 = vadd.xlane.f32.xlu0 %v704_v2  ;;  %185 = vmatprep.subr.bf16.mxu0 %v603_v15  ;;  %v527_v40 = vld [vmem:[%s857_s2] ss:$0 sm:$0xff]  ;;  %v624_v48 = vld [vmem:[%s858_s5 + $0x30] sm:$0xff]   ;;  %v625_v49 = vld [vmem:[%s858_s5 + $0x68] sm:$0xff]   ;;  %v93_v63 = vsub.s32 0, %v92_v62  ;;  %v97_v3 = vsub.s32 1, %v92_v62 }
   0x9   :  { %575 = vmatpush3.bf16.msra.mxu1 %v622_v46  ;;  %v626_v50 = vld [vmem:[%s858_s5 + $0x28] sm:$0xff]   ;;  %v627_v51 = vld [vmem:[%s858_s5 + $0x60] sm:$0xff]   ;;  %v629_v53 = vld [vmem:[%s858_s5 + $0x58] sm:$0xff]  }
   0xa   :  { %576 = vmatprep.subr.bf16.mxu1 %v623_v47  ;;  %v628_v52 = vld [vmem:[%s858_s5 + $0x20] sm:$0xff]   ;;  %v630_v54 = vld [vmem:[%s858_s5 + $0x18] sm:$0xff]   ;;  %v631_v55 = vld [vmem:[%s858_s5 + $0x50] sm:$0xff]  }
   0xb   :  { %186 = vmatpush1.bf16.msra.mxu0 %v605_v16  ;;  %v632_v56 = vld [vmem:[%s858_s5 + $0x10] sm:$0xff]   ;;  %v633_v57 = vld [vmem:[%s858_s5 + $0x48] sm:$0xff]   ;;  %v635_v59 = vld [vmem:[%s858_s5 + $0x40] sm:$0xff]  }
   0xc   :  { %187 = vmatprep.subr.bf16.mxu0 %v606_v17  ;;  %v634_v58 = vld [vmem:[%s858_s5 + $0x8] sm:$0xff]   ;;  %v636_v60 = vld [vmem:[%s858_s5] sm:$0xff]  }
   0xd   :  { %577 = vmatpush3.bf16.msra.mxu1 %v624_v48  ;;  %v89_v0 = vld [vmem:[%s859_s4] sm:$0x3] }
   0xe   :  { %578 = vmatprep.subr.bf16.mxu1 %v625_v49  ;;  %v94_v4 = vrot.slane %v89_v0, %v93_v63 }
   0xf   :  { %188 = vmatpush1.bf16.msra.mxu0 %v608_v18 }
  0x10   :  { %189 = vmatprep.subr.bf16.mxu0 %v609_v19 }
  0x11   :  { %579 = vmatpush3.bf16.msra.mxu1 %v626_v50 }
  0x12   :  { %580 = vmatprep.subr.bf16.mxu1 %v627_v51 }
  0x13   :  { %190 = vmatpush1.bf16.msra.mxu0 %v611_v20 }
  0x14   :  { %191 = vmatprep.subr.bf16.mxu0 %v612_v21 }
  0x15   :  { %581 = vmatpush3.bf16.msra.mxu1 %v628_v52 }
  0x16   :  { %582 = vmatprep.subr.bf16.mxu1 %v629_v53 }
  0x17   :  { %192 = vmatpush1.bf16.msra.mxu0 %v614_v23 }
  0x18   :  { %193 = vmatprep.subr.bf16.mxu0 %v615_v24 }
  0x19   :  { %583 = vmatpush3.bf16.msra.mxu1 %v630_v54 }
  0x1a   :  { %584 = vmatprep.subr.bf16.mxu1 %v631_v55 }
  0x1b   :  { %194 = vmatpush1.bf16.msra.mxu0 %v617_v25 }
  0x1c   :  { %195 = vmatprep.subr.bf16.mxu0 %v618_v26 }
  0x1d   :  { %585 = vmatpush3.bf16.msra.mxu1 %v632_v56 }
  0x1e   :  { %586 = vmatprep.subr.bf16.mxu1 %v633_v57 }
  0x1f   :  { %196 = vmatpush1.bf16.msra.mxu0 %v620_v27 }
  0x21   :  { %587 = vmatpush3.bf16.msra.mxu1 %v634_v58 }
  0x22   :  { %588 = vmatprep.subr.bf16.mxu1 %v635_v59 }
  0x25   :  { %589 = vmatpush3.bf16.msra.mxu1 %v636_v60 }
  0x8d   :  { %v34_v5 = vpop.xlane.xlu0 %33 }
  0x8e   :  { %v38_v6 = vmul.f32 0.0078125, %v34_v5  ;;  %v98_v5 = vrot.slane %v89_v0, %v97_v3 }
  0x90   :  { %v40_v7 = vsub.f32 %v701_v1, %v38_v6 }
  0x91   :  { %v36_v8 = vpop.xlane.xlu0 %35 }
  0x92   :  { %v39_v9 = vmul.f32 0.0078125, %v36_v8  ;;  %v42_v10 = vmul.f32 %v40_v7, %v40_v7 }
  0x94   :  { %v41_v11 = vsub.f32 %v704_v2, %v39_v9  ;;  %44 = vadd.xlane.f32.xlu1 %v42_v10 }
  0x96   :  { %v43_v12 = vmul.f32 %v41_v11, %v41_v11 }
  0x98   :  { %46 = vadd.xlane.f32.xlu1 %v43_v12 }
 0x11d   :  { %v45_v28 = vpop.xlane.xlu1 %44 }
 0x11e   :  { %v48_v29 = vmul.f32 0.0078125, %v45_v28 }
 0x120   :  { %v50_v30 = vadd.f32 1e-05, %v48_v29 }
 0x121   :  { %v47_v31 = vpop.xlane.xlu1 %46 }
 0x122   :  { %637 = vrsqrt.f32 %v50_v30  ;;  %v49_v32 = vmul.f32 0.0078125, %v47_v31 }
 0x124   :  { %v51_v33 = vadd.f32 1e-05, %v49_v32 }
 0x126   :  { %639 = vrsqrt.f32 %v51_v33 }
 0x12f   :  { %v638_v34 = vpop.eup %637 }
 0x130   :  { %v54_v35 = vmul.f32 %v638_v34, %v40_v7 }
 0x132   :  { %v62_v39 = vmul.f32 %v526_v36, %v54_v35 }
 0x133   :  { %v640_v37 = vpop.eup %639 }
 0x134   :  { %v55_v38 = vmul.f32 %v640_v37, %v41_v11  ;;  %v70_v42 = vadd.f32 %v527_v40, %v62_v39 }
 0x136   :  { %v63_v41 = vmul.f32 %v526_v36, %v55_v38 }
 0x138   :  { %v71_v43 = vadd.f32 %v527_v40, %v63_v41 }
 0x13a   :  { %v72_v44 = vpack.c.bf16 %v71_v43, %v70_v42 }
 0x13c   :  { %214 = vmatmul.mubr.bf16.vlgmr.msra.gmra.mxu0 %v72_v44 }
 0x1fc   :  { %v215_v6 = vpop.f32.mrf.mxu0 }
 0x1fd   :  { %v814_v7 = vadd.f32 %v215_v6, %v94_v4 }
 0x1fe   :  { %v217_v8 = vpop.f32.mrf.mxu0 }
 0x1ff   :  { %v817_v9 = vmul.f32 0.70710677, %v814_v7  ;;  %v819_v10 = vadd.f32 %v217_v8, %v98_v5 }
 0x200   :  { %v219_v11 = vpop.f32.mrf.mxu0 }
 0x201   :  { %v232_v12 = vand.u32 2147483647, %v817_v9  ;;  %v823_v13 = vmul.f32 0.70710677, %v819_v10  ;;  %v825_v14 = vadd.f32 %v219_v11, %v94_v4  ;;  %vm312_vm1 = vcmp.ge.f32.partialorder %v817_v9, 0.0 }
 0x202   :  { %v221_v15 = vpop.f32.mrf.mxu0 }
 0x203   :  { %v236_v16 = vmul.f32 0.3275911, %v232_v12  ;;  %v233_v17 = vand.u32 2147483647, %v823_v13  ;;  %v829_v18 = vmul.f32 0.70710677, %v825_v14  ;;  %v831_v19 = vadd.f32 %v221_v15, %v98_v5 }
 0x204   :  { %v288_v30 = vsub.f32 0.0, %v232_v12  ;;  %vm313_vm0 = vcmp.ge.f32.partialorder %v823_v13, 0.0  ;;  %v225_v13 = vmul.f32 0.5, %v819_v10  ;;  %v544_v10 = vld [vmem:[%s860_s6] ss:$0 sm:$0xff] }
 0x205   :  { %v240_v20 = vadd.f32 1.0, %v236_v16  ;;  %v237_v21 = vmul.f32 0.3275911, %v233_v17  ;;  %v234_v22 = vand.u32 2147483647, %v829_v18  ;;  %v289_v31 = vsub.f32 0.0, %v233_v17 }
 0x206   :  { %v835_v23 = vmul.f32 0.70710677, %v831_v19  ;;  %v292_v32 = vmul.f32 %v288_v30, %v232_v12  ;;  %vm314_vm2 = vcmp.ge.f32.partialorder %v829_v18, 0.0  ;;  %v224_v18 = vmul.f32 0.5, %v814_v7 }
 0x207   :  { %641 = vrcp.f32 %v240_v20  ;;  %v241_v24 = vadd.f32 1.0, %v237_v21  ;;  %v238_v25 = vmul.f32 0.3275911, %v234_v22  ;;  %v290_v33 = vsub.f32 0.0, %v234_v22 }
 0x208   :  { %v235_v26 = vand.u32 2147483647, %v835_v23  ;;  %v293_v35 = vmul.f32 %v289_v31, %v233_v17  ;;  %v296_v37 = vmul.f32 1.442695, %v292_v32  ;;  %vm315_vm3 = vcmp.ge.f32.partialorder %v835_v23, 0.0 }
 0x209   :  { %643 = vrcp.f32 %v241_v24  ;;  %v242_v27 = vadd.f32 1.0, %v238_v25  ;;  %v294_v39 = vmul.f32 %v290_v33, %v234_v22 }
 0x20a   :  { %v239_v28 = vmul.f32 0.3275911, %v235_v26  ;;  %v291_v38 = vsub.f32 0.0, %v235_v26  ;;  %v298_v42 = vmul.f32 1.442695, %v293_v35 }
 0x20b   :  { %645 = vrcp.f32 %v242_v27  ;;  %v300_v48 = vmul.f32 1.442695, %v294_v39 }
 0x20c   :  { %v243_v29 = vadd.f32 1.0, %v239_v28  ;;  %v295_v46 = vmul.f32 %v291_v38, %v235_v26 }
 0x20e   :  { %647 = vrcp.f32 %v243_v29  ;;  %v302_v55 = vmul.f32 1.442695, %v295_v46 }
 0x20f   :  { %649 = vpow2.f32 %v296_v37 }
 0x210   :  { %651 = vpow2.f32 %v298_v42 }
 0x211   :  { %653 = vpow2.f32 %v300_v48 }
 0x212   :  { %655 = vpow2.f32 %v302_v55 }
 0x214   :  { %v642_v34 = vpop.eup %641 }
 0x215   :  { %v252_v36 = vmul.f32 1.0614054, %v642_v34 }
 0x216   :  { %v644_v40 = vpop.eup %643 }
 0x217   :  { %v256_v41 = vadd.f32 -1.4531521, %v252_v36  ;;  %v253_v43 = vmul.f32 1.0614054, %v644_v40 }
 0x218   :  { %v646_v44 = vpop.eup %645 }
 0x219   :  { %v260_v45 = vmul.f32 %v642_v34, %v256_v41  ;;  %v254_v47 = vmul.f32 1.0614054, %v646_v44  ;;  %v257_v49 = vadd.f32 -1.4531521, %v253_v43 }
 0x21b   :  { %v264_v50 = vadd.f32 1.4214138, %v260_v45  ;;  %v648_v51 = vpop.eup %647  ;;  %v258_v52 = vadd.f32 -1.4531521, %v254_v47  ;;  %v261_v53 = vmul.f32 %v644_v40, %v257_v49 }
 0x21c   :  { %v255_v56 = vmul.f32 1.0614054, %v648_v51  ;;  %v650_v16 = vpop.eup %649 }
 0x21d   :  { %v268_v54 = vmul.f32 %v642_v34, %v264_v50  ;;  %v262_v57 = vmul.f32 %v646_v44, %v258_v52  ;;  %v265_v58 = vadd.f32 1.4214138, %v261_v53  ;;  %v652_v26 = vpop.eup %651  ;;  %v226_v50 = vmul.f32 0.5, %v825_v14 }
 0x21e   :  { %v259_v60 = vadd.f32 -1.4531521, %v255_v56  ;;  %v654_v31 = vpop.eup %653  ;;  %v227_v52 = vmul.f32 0.5, %v831_v19 }
 0x21f   :  { %v272_v59 = vadd.f32 -0.28449672, %v268_v54  ;;  %v266_v61 = vadd.f32 1.4214138, %v262_v57  ;;  %v269_v62 = vmul.f32 %v644_v40, %v265_v58  ;;  %v656_v37 = vpop.eup %655 }
 0x220   :  { %v263_v0 = vmul.f32 %v648_v51, %v259_v60 }
 0x221   :  { %v276_v63 = vmul.f32 %v642_v34, %v272_v59  ;;  %v270_v3 = vmul.f32 %v646_v44, %v266_v61  ;;  %v273_v4 = vadd.f32 -0.28449672, %v269_v62 }
 0x222   :  { %v267_v6 = vadd.f32 1.4214138, %v263_v0 }
 0x223   :  { %v280_v5 = vadd.f32 0.2548296, %v276_v63  ;;  %v274_v8 = vadd.f32 -0.28449672, %v270_v3  ;;  %v277_v11 = vmul.f32 %v644_v40, %v273_v4 }
 0x224   :  { %v271_v15 = vmul.f32 %v648_v51, %v267_v6 }
 0x225   :  { %v284_v12 = vmul.f32 %v642_v34, %v280_v5  ;;  %v278_v17 = vmul.f32 %v646_v44, %v274_v8  ;;  %v281_v20 = vadd.f32 0.2548296, %v277_v11 }
 0x226   :  { %v275_v22 = vadd.f32 -0.28449672, %v271_v15 }
 0x227   :  { %v304_v21 = vmul.f32 %v650_v16, %v284_v12  ;;  %v282_v24 = vadd.f32 0.2548296, %v278_v17  ;;  %v285_v25 = vmul.f32 %v644_v40, %v281_v20 }
 0x228   :  { %v279_v27 = vmul.f32 %v648_v51, %v275_v22 }
 0x229   :  { %v308_v28 = vsub.f32 1.0, %v304_v21  ;;  %v286_v29 = vmul.f32 %v646_v44, %v282_v24  ;;  %v305_v30 = vmul.f32 %v652_v26, %v285_v25 }
 0x22a   :  { %v283_v32 = vadd.f32 0.2548296, %v279_v27 }
 0x22b   :  { %v306_v33 = vmul.f32 %v654_v31, %v286_v29  ;;  %v309_v35 = vsub.f32 1.0, %v305_v30  ;;  %v316_v34 = vsub.f32 0.0, %v308_v28 }
 0x22c   :  { %v287_v36 = vmul.f32 %v648_v51, %v283_v32 }
 0x22d   :  { %v310_v38 = vsub.f32 1.0, %v306_v33  ;;  %v317_v39 = vsub.f32 0.0, %v309_v35  ;;  %v320_v44 = vsel %vm312_vm1, %v308_v28, %v316_v34 }
 0x22e   :  { %v307_v41 = vmul.f32 %v656_v37, %v287_v36  ;;  %v324_v49 = vadd.f32 1.0, %v320_v44 }
 0x22f   :  { %v318_v42 = vsub.f32 0.0, %v310_v38  ;;  %v321_v43 = vsel %vm313_vm0, %v309_v35, %v317_v39 }
 0x230   :  { %v311_v40 = vsub.f32 1.0, %v307_v41  ;;  %v325_v48 = vadd.f32 1.0, %v321_v43  ;;  %v328_v56 = vmul.f32 %v324_v49, %v224_v18 }
 0x231   :  { %v322_v45 = vsel %vm314_vm2, %v310_v38, %v318_v42 }
 0x232   :  { %v326_v46 = vadd.f32 1.0, %v322_v45  ;;  %v319_v47 = vsub.f32 0.0, %v311_v40  ;;  %v329_v54 = vmul.f32 %v325_v48, %v225_v13 }
 0x234   :  { %v323_v51 = vsel %vm315_vm3, %v311_v40, %v319_v47  ;;  %v330_v53 = vmul.f32 %v326_v46, %v226_v50 }
 0x235   :  { %v327_v9 = vadd.f32 1.0, %v323_v51 }
 0x236   :  { %v332_v58 = vpack.c.bf16 %v330_v53, %v328_v56 }
 0x237   :  { %v331_v55 = vmul.f32 %v327_v9, %v227_v52 }
 0x239   :  { %v333_v57 = vpack.c.bf16 %v331_v55, %v329_v54 }
 0x23b   :  { %501 = vmatprep.mubr.bf16.mxu1 %v333_v57 }
 0x23c   :  { %502 = vmatmul.mubr.bf16.vlgmr.msra.gmra.mxu1 %v332_v58 }
 0x2fc   :  { %v590_v23 = vpop.f32.mrf.mxu1 }
 0x2fe   :  { %v591_v59 = vpop.f32.mrf.mxu1 }
 0x2ff   :  { %v592_v60 = vadd.f32 %v591_v59, %v590_v23 }
 0x300   :  { %v593_v14 = vpop.f32.mrf.mxu1 }
 0x301   :  { %v504_v61 = vadd.f32 %v592_v60, %v544_v10 }
 0x302   :  { %v594_v19 = vpop.f32.mrf.mxu1 }
 0x303   :  { %v595_v62 = vadd.f32 %v594_v19, %v593_v14  ;;  %v510_v63 = vadd.f32 %v701_v1, %v504_v61 }
 0x305   :  { %v507_v7 = vadd.f32 %v595_v62, %v544_v10 }
 0x307   :  { %v511_v0 = vadd.f32 %v704_v2, %v507_v7 }
 0x309   :  { %v572_v3 = vpack.c.bf16 %v511_v0, %v510_v63 }
 0x30b   :  { %573 = vst [vmem:[%s861_s7] sm:$0xff] %v572_v3  }

// kernel: vit_forward.11
= control target key start
LH: loop header
LB: loop body
LE: loop exit
PB: predicated region body
PF: predicated region fallthrough
CT: control target
= control target key end

     0   :  { %vm37_vm0 = vcmask 1041409   ;;  %vm40_vm1 = vcmask 1041408   ;;  %s582_s0 = inlined_call_operand.vmem [shape: bf16[2,8,128], index: 0, kind: input, shape index: {}]   ;;  %s583_s1 = inlined_call_operand.vmem [shape: f32[1,128], index: 1, kind: input, shape index: {}]   ;;  %s584_s2 = inlined_call_operand.vmem [shape: f32[1,128], index: 2, kind: input, shape index: {}]   ;;  %s585_s3 = inlined_call_operand.vmem [shape: bf16[128,128], index: 3, kind: input, shape index: {}]   ;;  %s586_s4 = inlined_call_operand.vmem [shape: f32[1,128], index: 4, kind: input, shape index: {}]   ;;  %s587_s5 = inlined_call_operand.vmem [shape: bf16[128,16], index: 5, kind: input, shape index: {}]   ;;  %s588_s6 = inlined_call_operand.vmem [shape: f32[1,16], index: 6, kind: input, shape index: {}]   ;;  %s589_s7 = inlined_call_operand.hbm [shape: f32[2,16], index: 7, kind: output, shape index: {}]  }
   0x1   :  { %v28_v0 = vld [vmem:[%s582_s0] sm:$0x1]  ;;  %v29_v1 = vld [vmem:[%s582_s0 + $0x4] sm:$0x1] }
   0x2   :  { %v30_v2 = vunpack.c.l.bf16 %v28_v0  ;;  %v31_v3 = vunpack.c.l.bf16 %v29_v1 }
   0x4   :  { %v36_v4 = vrot.slane %v31_v3, 7 }
   0x6   :  { %v38_v5 = vsel %vm37_vm0, %v36_v4, %v30_v2 }
   0x7   :  { %v41_v6 = vsel %vm40_vm1, %v38_v5, 0.0 }
   0x8   :  { %42 = vadd.xlane.f32.xlu0 %v41_v6 }
   0x9   :  { %12 = vsyncpa [#allocation3], 0  ;;  %v417_v17 = vld [vmem:[%s585_s3 + $0x38] sm:$0xff]   ;;  %v457_v18 = vmov 0.0   ;;  %v418_v19 = vld [vmem:[%s585_s3 + $0x30] sm:$0xff]   ;;  %vm458_vm2 = vmmov 0  }
   0xa   :  { %374 = vmatprep.subr.bf16.mxu0 %v457_v18  ;;  %394 = vmatprep.subr.bf16.mxu1 %v457_v18  ;;  %v419_v20 = vld [vmem:[%s585_s3 + $0x28] sm:$0xff]   ;;  %v420_v21 = vld [vmem:[%s585_s3 + $0x20] sm:$0xff]   ;;  %v421_v22 = vld [vmem:[%s585_s3 + $0x18] sm:$0xff]   ;;  %s459_s17 = smov [#allocation2]   ;;  %vm320_vm3 = vcmask 123904  }
   0xb   :  { %375 = vmatpush3.bf16.msra.mxu0 %v417_v17  ;;  %390 = vmatprep.mubr.msk.bf16.mxu0 %vm458_vm2, %v457_v18  ;;  %v422_v23 = vld [vmem:[%s585_s3 + $0x10] sm:$0xff]   ;;  %v423_v24 = vld [vmem:[%s585_s3 + $0x8] sm:$0xff]   ;;  %v424_v25 = vld [vmem:[%s585_s3] sm:$0xff]   ;;  %s328_s18 = sshll.u32 %s459_s17, 4  ;;  %s329_s18 = int_to_ptr.vmem [resolvable:$true] %s328_s18 }
   0xc   :  { %376 = vmatprep.subr.bf16.mxu0 %v457_v18  ;;  %410 = vmatprep.mubr.msk.bf16.mxu1 %vm458_vm2, %v457_v18  ;;  %v425_v26 = vld [vmem:[%s587_s5 + $0x38] sm:$0xff]   ;;  %v426_v27 = vld [vmem:[%s587_s5 + $0x30] sm:$0xff]   ;;  %v427_v28 = vld [vmem:[%s587_s5 + $0x28] sm:$0xff]   ;;  %p440_p1 = scmp.lt.s32.totalorder %s329_s18, %s329_s18 }
   0xd   :  { %395 = vmatpush3.bf16.msra.mxu1 %v425_v26  ;;  %v428_v29 = vld [vmem:[%s587_s5 + $0x20] sm:$0xff]   ;;  %v429_v30 = vld [vmem:[%s587_s5 + $0x18] sm:$0xff]   ;;  %v430_v31 = vld [vmem:[%s587_s5 + $0x10] sm:$0xff]  }
   0xe   :  { %396 = vmatprep.subr.bf16.mxu1 %v457_v18  ;;  %v431_v32 = vld [vmem:[%s587_s5 + $0x8] sm:$0xff]   ;;  %v336_v37 = vld [vmem:[%s583_s1] ss:$0 sm:$0xff] }
   0xf   :  { %377 = vmatpush3.bf16.msra.mxu0 %v418_v19  ;;  %v337_v40 = vld [vmem:[%s584_s2] ss:$0 sm:$0xff] }
  0x10   :  { %378 = vmatprep.subr.bf16.mxu0 %v457_v18  ;;  %v432_v53 = vld [vmem:[%s587_s5] sm:$0xff]  }
  0x11   :  { %397 = vmatpush3.bf16.msra.mxu1 %v426_v27  ;;  %v338_v54 = vld [vmem:[%s586_s4] ss:$0 sm:$0xff]  ;;  %s435_s4 = scalar_lea.vmem %s329_s18, 32 }
  0x12   :  { %398 = vmatprep.subr.bf16.mxu1 %v457_v18  ;;  %v347_v61 = vld [vmem:[%s588_s6] ss:$0 sm:$0xff]  ;;  %p436_p0 = scmp.ne.s32.totalorder %s329_s18, %s435_s4  ;;  %p441_p2 = scmp.lt.s32.totalorder %s435_s4, %s435_s4 }
  0x13   :  { %379 = vmatpush3.bf16.msra.mxu0 %v419_v20 }
  0x14   :  { %380 = vmatprep.subr.bf16.mxu0 %v457_v18  ;;  %p442_p3 = por %p441_p2, %p440_p1 }
  0x15   :  { %399 = vmatpush3.bf16.msra.mxu1 %v427_v28 }
  0x16   :  { %400 = vmatprep.subr.bf16.mxu1 %v457_v18  ;;  %p443_p4 = pnand %p442_p3, %p436_p0 }
  0x17   :  { %381 = vmatpush3.bf16.msra.mxu0 %v420_v21 }
  0x18   :  { %382 = vmatprep.subr.bf16.mxu0 %v457_v18 }
  0x19   :  { %401 = vmatpush3.bf16.msra.mxu1 %v428_v29 }
  0x1a   :  { %402 = vmatprep.subr.bf16.mxu1 %v457_v18 }
  0x1b   :  { %383 = vmatpush3.bf16.msra.mxu0 %v421_v22 }
  0x1c   :  { %384 = vmatprep.subr.bf16.mxu0 %v457_v18 }
  0x1d   :  { %403 = vmatpush3.bf16.msra.mxu1 %v429_v30 }
  0x1e   :  { %404 = vmatprep.subr.bf16.mxu1 %v457_v18 }
  0x1f   :  { %385 = vmatpush3.bf16.msra.mxu0 %v422_v23 }
  0x20   :  { %386 = vmatprep.subr.bf16.mxu0 %v457_v18 }
  0x21   :  { %405 = vmatpush3.bf16.msra.mxu1 %v430_v31 }
  0x22   :  { %406 = vmatprep.subr.bf16.mxu1 %v457_v18 }
  0x23   :  { %387 = vmatpush3.bf16.msra.mxu0 %v423_v24 }
  0x24   :  { %388 = vmatprep.subr.bf16.mxu0 %v457_v18 }
  0x25   :  { %407 = vmatpush3.bf16.msra.mxu1 %v431_v32 }
  0x26   :  { %408 = vmatprep.subr.bf16.mxu1 %v457_v18 }
  0x27   :  { %389 = vmatpush3.bf16.msra.mxu0 %v424_v25 }
  0x29   :  { %409 = vmatpush3.bf16.msra.mxu1 %v432_v53 }
  0x91   :  { %v43_v7 = vpop.xlane.xlu0 %42 }
  0x92   :  { %v45_v8 = vmul.f32 0.0078125, %v43_v7 }
  0x94   :  { %v47_v9 = vrot.slane %v45_v8, 1  ;;  %v507_v10 = vsub.f32 %v30_v2, %v45_v8 }
  0x96   :  { %v509_v11 = vsub.f32 %v31_v3, %v47_v9  ;;  %v52_v13 = vmul.f32 %v507_v10, %v507_v10 }
  0x98   :  { %v53_v12 = vmul.f32 %v509_v11, %v509_v11 }
  0x9a   :  { %v56_v14 = vrot.slane %v53_v12, 7 }
  0x9c   :  { %v57_v15 = vsel %vm37_vm0, %v56_v14, %v52_v13 }
  0x9d   :  { %v59_v16 = vsel %vm40_vm1, %v57_v15, 0.0 }
  0x9e   :  { %60 = vadd.xlane.f32.xlu0 %v59_v16 }
 0x127   :  { %v61_v33 = vpop.xlane.xlu0 %60 }
 0x128   :  { %v62_v34 = vmul.f32 0.0078125, %v61_v33 }
 0x12a   :  { %v63_v35 = vadd.f32 1e-05, %v62_v34 }
 0x12c   :  { %433 = vrsqrt.f32 %v63_v35 }
 0x139   :  { %v434_v36 = vpop.eup %433 }
 0x13a   :  { %v66_v38 = vrot.slane %v434_v36, 1  ;;  %v69_v39 = vmul.f32 %v434_v36, %v507_v10 }
 0x13c   :  { %v70_v41 = vmul.f32 %v66_v38, %v509_v11  ;;  %v77_v42 = vmul.f32 %v336_v37, %v69_v39 }
 0x13e   :  { %v78_v43 = vmul.f32 %v336_v37, %v70_v41  ;;  %v85_v44 = vadd.f32 %v337_v40, %v77_v42 }
 0x140   :  { %v86_v45 = vadd.f32 %v337_v40, %v78_v43  ;;  %v87_v46 = vpack.c.bf16 %v85_v44, %v85_v44 }
 0x142   :  { %v88_v47 = vpack.c.bf16 %v86_v45, %v86_v45  ;;  %v114_v49 = vunpack.c.l.b16 %v87_v46 }
 0x144   :  { %v115_v48 = vunpack.c.l.b16 %v88_v47 }
 0x146   :  { %v116_v50 = vrot.slane %v115_v48, 7 }
 0x148   :  { %v117_v51 = vsel %vm37_vm0, %v116_v50, %v114_v49 }
 0x149   :  { %v118_v52 = vpack.c.b16 %v117_v51, %v117_v51 }
 0x14b   :  { %391 = vmatmul.mubr.bf16.vlgmr.msra.gmra.mxu0 %v118_v52 }
 0x20b   :  { %v202_v55 = vpop.f32.mrf.mxu0 }
 0x20c   :  { %v203_v56 = vadd.f32 %v338_v54, %v202_v55 }
 0x20d   :  { %v392_v57 = vpop.f32.mrf.mxu0 }
 0x20e   :  { %v208_v58 = vpack.c.bf16 %v203_v56, %v203_v56 }
 0x20f   :  { %v205_v59 = vpop.f32.mrf.mxu0 }
 0x210   :  { %411 = vmatmul.mubr.bf16.vlgmr.msra.gmra.mxu1 %v208_v58 }
 0x211   :  { %v393_v60 = vpop.f32.mrf.mxu0 }
 0x2d0   :  { %v314_v62 = vpop.f32.mrf.mxu1 }
 0x2d1   :  { %v315_v63 = vadd.f32 %v347_v61, %v314_v62 }
 0x2d2   :  { %v412_v0 = vpop.f32.mrf.mxu1 }
 0x2d3   :  { %321 = vst.msk [vmem:[#allocation2] sm:$0x3] %vm320_vm3, %v315_v63 }
 0x2d4   :  { %v317_v1 = vpop.f32.mrf.mxu1 }
 0x2d5   :  { %446 = shalt.err (!%p443_p4)
}
 0x2d6   :  { %331 = dma.vmem_to_hbm [thread:$0]  %s329_s18, 32, %s589_s7, [#allocation3]   ;;  %v413_v2 = vpop.f32.mrf.mxu1 }
 0x2d7   :  { %455 = dma.done.wait [#allocation3], 32  }
 0x2d8   :  { %456 = vsyncadd [#allocation3], 4294967264 }
 0x2d9   :  { %335 = vsyncpa [#allocation3], 1 }

</bundles_post_ra>
